<compile_context>
chip_gen: v7x
topology: tpu7x:2x2x1
jax: 0.10.0
libtpu: 0.0.40
codegen_flags: <defaults>
</compile_context>

<pallas_src>
import functools

import jax
import jax.numpy as jnp
from jax.experimental import pallas as pl
from jax.experimental.pallas import tpu as pltpu


def _denoiser_kernel(x_ref, masks_ref, w1_ref, b1_ref, w2_ref, b2_ref,
                     w3_ref, b3_ref, o_ref, *, H, W, Bt):
    # x_ref    : (Bt, C0, H*W)   batch tile of NCHW images, spatial flattened
    # masks_ref: (9, H*W)        per-tap zero-padding masks (1.0 = valid)
    # wK_ref   : (9, Cout, Cin)  per-tap conv weights
    # bK_ref   : (Cout, 1)       biases (broadcast along lanes)
    # o_ref    : (Bt, C3, H*W)
    HW = H * W
    masks = masks_ref[...]                              # (9, HW)

    def conv3x3(x, w_ref, b_ref, relu):
        # x: (Cin, HW) f32 -> (Cout, HW) f32
        cout = w_ref.shape[1]
        acc = jnp.zeros((cout, HW), jnp.float32)
        for dy in range(3):
            for dx in range(3):
                t = dy * 3 + dx
                s = (dy - 1) * W + (dx - 1)             # source pixel offset
                if s == 0:
                    xs = x                              # center tap: no shift,
                    #                                     mask is all-ones
                else:
                    # shifted[p] = x[p + s]  (wrap-around is masked below)
                    xs = pltpu.roll(x, shift=(-s) % HW, axis=1)
                    xs = xs * masks[t:t + 1, :]         # zero padding
                acc = acc + jnp.dot(w_ref[t], xs,
                                    preferred_element_type=jnp.float32)
        acc = acc + b_ref[...]                          # (Cout,1) lane-bcast
        if relu:
            acc = jnp.maximum(acc, 0.0)
        return acc

    for b in range(Bt):                                 # compile-time unroll
        a = x_ref[b]                                    # (C0, HW)
        a = conv3x3(a, w1_ref, b1_ref, relu=True)       # (C1, HW)
        a = conv3x3(a, w2_ref, b2_ref, relu=True)       # (C2, HW)
        a = conv3x3(a, w3_ref, b3_ref, relu=False)      # (C3, HW)
        o_ref[b] = a.astype(o_ref.dtype)                # lane-dense store


def _make_tap_masks(H, W):
    """(9, H*W) f32 masks: 1.0 where tap (dy,dx) reads a real pixel, 0.0 where
    it would read the zero padding (and where the flat roll wraps around)."""
    hh = jnp.arange(H, dtype=jnp.int32).reshape(H, 1)
    ww = jnp.arange(W, dtype=jnp.int32).reshape(1, W)
    rows = []
    for dy in range(3):
        for dx in range(3):
            oy, ox = dy - 1, dx - 1
            valid = ((hh + oy >= 0) & (hh + oy < H) &
                     (ww + ox >= 0) & (ww + ox < W))
            rows.append(valid.astype(jnp.float32).reshape(H * W))
    return jnp.stack(rows, axis=0)


def _pack_w(w_hwio):
    """HWIO (3,3,Cin,Cout) -> per-tap (9, Cout, Cin), tap index t = dy*3+dx."""
    cin, cout = w_hwio.shape[2], w_hwio.shape[3]
    return jnp.transpose(w_hwio, (0, 1, 3, 2)).reshape(9, cout, cin)


def basic_denoiser_pallas(x_nchw, params, *, batch_tile=None):
    """Fused forward pass. x_nchw: (N, 3, H, W) f32 -> (N, 3, H, W) f32."""
    (w1, b1), (w2, b2), (w3, b3) = params
    N, C0, H, W = x_nchw.shape
    HW = H * W
    C1, C2, C3 = w1.shape[-1], w2.shape[-1], w3.shape[-1]

    if batch_tile is None:
        # Amortize per-step overhead, but keep >= 2 parallel grid steps when
        # possible (megacore / v7x 2-TC).
        bt = max(1, min(8, N // 2))
        while N % bt:
            bt -= 1
        batch_tile = bt
    assert N % batch_tile == 0

    x = x_nchw.reshape(N, C0, HW)                       # free reshape (NCHW)
    masks = _make_tap_masks(H, W)                       # (9, HW)

    w1p, w2p, w3p = _pack_w(w1), _pack_w(w2), _pack_w(w3)
    b1c, b2c, b3c = b1.reshape(C1, 1), b2.reshape(C2, 1), b3.reshape(C3, 1)

    kernel = functools.partial(_denoiser_kernel, H=H, W=W, Bt=batch_tile)
    full2 = lambda n: (0, 0)
    full3 = lambda n: (0, 0, 0)

    y = pl.pallas_call(
        kernel,
        out_shape=jax.ShapeDtypeStruct((N, C3, HW), jnp.float32),
        grid_spec=pltpu.PrefetchScalarGridSpec(
            num_scalar_prefetch=0,
            grid=(N // batch_tile,),
            in_specs=[
                pl.BlockSpec((batch_tile, C0, HW), lambda n: (n, 0, 0)),
                pl.BlockSpec((9, HW), full2),
                pl.BlockSpec((9, C1, C0), full3),
                pl.BlockSpec((C1, 1), full2),
                pl.BlockSpec((9, C2, C1), full3),
                pl.BlockSpec((C2, 1), full2),
                pl.BlockSpec((9, C3, C2), full3),
                pl.BlockSpec((C3, 1), full2),
            ],
            out_specs=pl.BlockSpec((batch_tile, C3, HW), lambda n: (n, 0, 0)),
        ),
        compiler_params=pltpu.CompilerParams(
            dimension_semantics=("parallel",),
        ),
    )(x, masks, w1p, b1c, w2p, b2c, w3p, b3c)

    return y.reshape(N, C3, H, W)                       # free reshape


def init_params(key):
    """Deterministic synthetic parameters matching BasicDenoiser.__init__."""
    ks = jax.random.split(key, 6)

    def conv_init(kw, kb, cin, cout):
        fan_in = cin * 3 * 3
        bound = 1.0 / jnp.sqrt(fan_in)
        # stored as (3, 3, Cin, Cout) (HWIO); PyTorch uses (Cout, Cin, 3, 3)
        w = jax.random.uniform(kw, (3, 3, cin, cout), jnp.float32,
                               minval=-bound, maxval=bound)
        b = jax.random.uniform(kb, (cout,), jnp.float32,
                               minval=-bound, maxval=bound)
        return w, b

    w1, b1 = conv_init(ks[0], ks[1], 3, 16)
    w2, b2 = conv_init(ks[2], ks[3], 16, 32)
    w3, b3 = conv_init(ks[4], ks[5], 32, 3)
    return (w1, b1), (w2, b2), (w3, b3)


def basic_denoiser_ref(x_nchw, params):
    """Pure-JAX reference (lax conv) for correctness checking."""
    out = x_nchw
    for i, (w, b) in enumerate(params):
        out = jax.lax.conv_general_dilated(
            out, w, window_strides=(1, 1), padding="SAME",
            dimension_numbers=("NCHW", "HWIO", "NCHW"))
        out = out + b.reshape(1, -1, 1, 1)
        if i < 2:
            out = jnp.maximum(out, 0.0)
    return out


if __name__ == "__main__":
    key = jax.random.PRNGKey(0)
    k_params, k_x = jax.random.split(key)
    params = init_params(k_params)

    # Small deterministic input: batch=2, channels=3 (RGB), spatial=16x16, NCHW
    x = jax.random.normal(k_x, (2, 3, 16, 16), dtype=jnp.float32)

    y = basic_denoiser_pallas(x, params)
    y = jax.block_until_ready(y)

    y_ref = basic_denoiser_ref(x, params)
    assert y.shape == (2, 3, 16, 16)
    assert jnp.allclose(y, y_ref, atol=1e-4, rtol=1e-4)

    print("KERNEL_OK")
</pallas_src>

<mosaic_0001>
module attributes {stable_mosaic.version = 11 : i64} {
  func.func @_denoiser_kernel(%arg0: i32, %arg1: memref<1x3x256xf32, #tpu.memory_space<vmem>>, %arg2: memref<9x256xf32, #tpu.memory_space<vmem>>, %arg3: memref<9x16x3xf32, #tpu.memory_space<vmem>>, %arg4: memref<16x1xf32, #tpu.memory_space<vmem>>, %arg5: memref<9x32x16xf32, #tpu.memory_space<vmem>>, %arg6: memref<32x1xf32, #tpu.memory_space<vmem>>, %arg7: memref<9x3x32xf32, #tpu.memory_space<vmem>>, %arg8: memref<3x1xf32, #tpu.memory_space<vmem>>, %arg9: memref<1x3x256xf32, #tpu.memory_space<vmem>>) attributes {dimension_semantics = [#tpu.dimension_semantics<parallel>], iteration_bounds = array<i64: 2>, scalar_prefetch = 0 : i64, scratch_operands = 0 : i64, tpu.core_type = #tpu.core_type<tc>, window_params = [{transform_indices = @transform_0, window_bounds = array<i64: 1, 3, 256>}, {pipeline_mode = #tpu.pipeline_mode<synchronous>, transform_indices = @transform_1, window_bounds = array<i64: 9, 256>}, {pipeline_mode = #tpu.pipeline_mode<synchronous>, transform_indices = @transform_2, window_bounds = array<i64: 9, 16, 3>}, {pipeline_mode = #tpu.pipeline_mode<synchronous>, transform_indices = @transform_3, window_bounds = array<i64: 16, 1>}, {pipeline_mode = #tpu.pipeline_mode<synchronous>, transform_indices = @transform_4, window_bounds = array<i64: 9, 32, 16>}, {pipeline_mode = #tpu.pipeline_mode<synchronous>, transform_indices = @transform_5, window_bounds = array<i64: 32, 1>}, {pipeline_mode = #tpu.pipeline_mode<synchronous>, transform_indices = @transform_6, window_bounds = array<i64: 9, 3, 32>}, {pipeline_mode = #tpu.pipeline_mode<synchronous>, transform_indices = @transform_7, window_bounds = array<i64: 3, 1>}, {transform_indices = @transform_8, window_bounds = array<i64: 1, 3, 256>}]} {
    %c0 = arith.constant 0 : index
    %c0_0 = arith.constant 0 : index
    %0 = vector.load %arg2[%c0, %c0_0] : memref<9x256xf32, #tpu.memory_space<vmem>>, vector<9x256xf32>
    %c0_1 = arith.constant 0 : index
    %c0_2 = arith.constant 0 : index
    %c0_3 = arith.constant 0 : index
    %1 = vector.load %arg1[%c0_1, %c0_2, %c0_3] : memref<1x3x256xf32, #tpu.memory_space<vmem>>, vector<1x3x256xf32>
    %2 = vector.shape_cast %1 : vector<1x3x256xf32> to vector<3x256xf32>
    %cst = arith.constant 0.000000e+00 : f32
    %3 = vector.broadcast %cst : f32 to vector<16x256xf32>
    %c17_i32 = arith.constant 17 : i32
    %4 = tpu.dynamic_rotate %2 by %c17_i32 dim 1 : vector<3x256xf32>, i32 -> vector<3x256xf32>
    %5 = vector.extract_strided_slice %0 {offsets = [0, 0], sizes = [1, 256], strides = [1, 1]} : vector<9x256xf32> to vector<1x256xf32>
    %6 = vector.broadcast %5 : vector<1x256xf32> to vector<3x256xf32>
    %7 = arith.mulf %4, %6 : vector<3x256xf32>
    %c0_4 = arith.constant 0 : index
    %c0_5 = arith.constant 0 : index
    %c0_6 = arith.constant 0 : index
    %8 = vector.load %arg3[%c0_4, %c0_5, %c0_6] : memref<9x16x3xf32, #tpu.memory_space<vmem>>, vector<1x16x3xf32>
    %9 = vector.shape_cast %8 : vector<1x16x3xf32> to vector<16x3xf32>
    %cst_7 = arith.constant dense<0.000000e+00> : vector<16x256xf32>
    %10 = tpu.matmul %9, %7, %cst_7 {dimension_numbers = #tpu.dot_dimension_numbers<[1], [0], [0], [1], [0, 0, 1, 1], [], []>} : vector<16x3xf32>, vector<3x256xf32>, vector<16x256xf32> -> vector<16x256xf32>
    %11 = arith.addf %3, %10 : vector<16x256xf32>
    %c16_i32 = arith.constant 16 : i32
    %12 = tpu.dynamic_rotate %2 by %c16_i32 dim 1 : vector<3x256xf32>, i32 -> vector<3x256xf32>
    %13 = vector.extract_strided_slice %0 {offsets = [1, 0], sizes = [1, 256], strides = [1, 1]} : vector<9x256xf32> to vector<1x256xf32>
    %14 = vector.broadcast %13 : vector<1x256xf32> to vector<3x256xf32>
    %15 = arith.mulf %12, %14 : vector<3x256xf32>
    %c1 = arith.constant 1 : index
    %c0_8 = arith.constant 0 : index
    %c0_9 = arith.constant 0 : index
    %16 = vector.load %arg3[%c1, %c0_8, %c0_9] : memref<9x16x3xf32, #tpu.memory_space<vmem>>, vector<1x16x3xf32>
    %17 = vector.shape_cast %16 : vector<1x16x3xf32> to vector<16x3xf32>
    %cst_10 = arith.constant dense<0.000000e+00> : vector<16x256xf32>
    %18 = tpu.matmul %17, %15, %cst_10 {dimension_numbers = #tpu.dot_dimension_numbers<[1], [0], [0], [1], [0, 0, 1, 1], [], []>} : vector<16x3xf32>, vector<3x256xf32>, vector<16x256xf32> -> vector<16x256xf32>
    %19 = arith.addf %11, %18 : vector<16x256xf32>
    %c15_i32 = arith.constant 15 : i32
    %20 = tpu.dynamic_rotate %2 by %c15_i32 dim 1 : vector<3x256xf32>, i32 -> vector<3x256xf32>
    %21 = vector.extract_strided_slice %0 {offsets = [2, 0], sizes = [1, 256], strides = [1, 1]} : vector<9x256xf32> to vector<1x256xf32>
    %22 = vector.broadcast %21 : vector<1x256xf32> to vector<3x256xf32>
    %23 = arith.mulf %20, %22 : vector<3x256xf32>
    %c2 = arith.constant 2 : index
    %c0_11 = arith.constant 0 : index
    %c0_12 = arith.constant 0 : index
    %24 = vector.load %arg3[%c2, %c0_11, %c0_12] : memref<9x16x3xf32, #tpu.memory_space<vmem>>, vector<1x16x3xf32>
    %25 = vector.shape_cast %24 : vector<1x16x3xf32> to vector<16x3xf32>
    %cst_13 = arith.constant dense<0.000000e+00> : vector<16x256xf32>
    %26 = tpu.matmul %25, %23, %cst_13 {dimension_numbers = #tpu.dot_dimension_numbers<[1], [0], [0], [1], [0, 0, 1, 1], [], []>} : vector<16x3xf32>, vector<3x256xf32>, vector<16x256xf32> -> vector<16x256xf32>
    %27 = arith.addf %19, %26 : vector<16x256xf32>
    %c1_i32 = arith.constant 1 : i32
    %28 = tpu.dynamic_rotate %2 by %c1_i32 dim 1 : vector<3x256xf32>, i32 -> vector<3x256xf32>
    %29 = vector.extract_strided_slice %0 {offsets = [3, 0], sizes = [1, 256], strides = [1, 1]} : vector<9x256xf32> to vector<1x256xf32>
    %30 = vector.broadcast %29 : vector<1x256xf32> to vector<3x256xf32>
    %31 = arith.mulf %28, %30 : vector<3x256xf32>
    %c3 = arith.constant 3 : index
    %c0_14 = arith.constant 0 : index
    %c0_15 = arith.constant 0 : index
    %32 = vector.load %arg3[%c3, %c0_14, %c0_15] : memref<9x16x3xf32, #tpu.memory_space<vmem>>, vector<1x16x3xf32>
    %33 = vector.shape_cast %32 : vector<1x16x3xf32> to vector<16x3xf32>
    %cst_16 = arith.constant dense<0.000000e+00> : vector<16x256xf32>
    %34 = tpu.matmul %33, %31, %cst_16 {dimension_numbers = #tpu.dot_dimension_numbers<[1], [0], [0], [1], [0, 0, 1, 1], [], []>} : vector<16x3xf32>, vector<3x256xf32>, vector<16x256xf32> -> vector<16x256xf32>
    %35 = arith.addf %27, %34 : vector<16x256xf32>
    %c4 = arith.constant 4 : index
    %c0_17 = arith.constant 0 : index
    %c0_18 = arith.constant 0 : index
    %36 = vector.load %arg3[%c4, %c0_17, %c0_18] : memref<9x16x3xf32, #tpu.memory_space<vmem>>, vector<1x16x3xf32>
    %37 = vector.shape_cast %36 : vector<1x16x3xf32> to vector<16x3xf32>
    %cst_19 = arith.constant dense<0.000000e+00> : vector<16x256xf32>
    %38 = tpu.matmul %37, %2, %cst_19 {dimension_numbers = #tpu.dot_dimension_numbers<[1], [0], [0], [1], [0, 0, 1, 1], [], []>} : vector<16x3xf32>, vector<3x256xf32>, vector<16x256xf32> -> vector<16x256xf32>
    %39 = arith.addf %35, %38 : vector<16x256xf32>
    %c255_i32 = arith.constant 255 : i32
    %40 = tpu.dynamic_rotate %2 by %c255_i32 dim 1 : vector<3x256xf32>, i32 -> vector<3x256xf32>
    %41 = vector.extract_strided_slice %0 {offsets = [5, 0], sizes = [1, 256], strides = [1, 1]} : vector<9x256xf32> to vector<1x256xf32>
    %42 = vector.broadcast %41 : vector<1x256xf32> to vector<3x256xf32>
    %43 = arith.mulf %40, %42 : vector<3x256xf32>
    %c5 = arith.constant 5 : index
    %c0_20 = arith.constant 0 : index
    %c0_21 = arith.constant 0 : index
    %44 = vector.load %arg3[%c5, %c0_20, %c0_21] : memref<9x16x3xf32, #tpu.memory_space<vmem>>, vector<1x16x3xf32>
    %45 = vector.shape_cast %44 : vector<1x16x3xf32> to vector<16x3xf32>
    %cst_22 = arith.constant dense<0.000000e+00> : vector<16x256xf32>
    %46 = tpu.matmul %45, %43, %cst_22 {dimension_numbers = #tpu.dot_dimension_numbers<[1], [0], [0], [1], [0, 0, 1, 1], [], []>} : vector<16x3xf32>, vector<3x256xf32>, vector<16x256xf32> -> vector<16x256xf32>
    %47 = arith.addf %39, %46 : vector<16x256xf32>
    %c241_i32 = arith.constant 241 : i32
    %48 = tpu.dynamic_rotate %2 by %c241_i32 dim 1 : vector<3x256xf32>, i32 -> vector<3x256xf32>
    %49 = vector.extract_strided_slice %0 {offsets = [6, 0], sizes = [1, 256], strides = [1, 1]} : vector<9x256xf32> to vector<1x256xf32>
    %50 = vector.broadcast %49 : vector<1x256xf32> to vector<3x256xf32>
    %51 = arith.mulf %48, %50 : vector<3x256xf32>
    %c6 = arith.constant 6 : index
    %c0_23 = arith.constant 0 : index
    %c0_24 = arith.constant 0 : index
    %52 = vector.load %arg3[%c6, %c0_23, %c0_24] : memref<9x16x3xf32, #tpu.memory_space<vmem>>, vector<1x16x3xf32>
    %53 = vector.shape_cast %52 : vector<1x16x3xf32> to vector<16x3xf32>
    %cst_25 = arith.constant dense<0.000000e+00> : vector<16x256xf32>
    %54 = tpu.matmul %53, %51, %cst_25 {dimension_numbers = #tpu.dot_dimension_numbers<[1], [0], [0], [1], [0, 0, 1, 1], [], []>} : vector<16x3xf32>, vector<3x256xf32>, vector<16x256xf32> -> vector<16x256xf32>
    %55 = arith.addf %47, %54 : vector<16x256xf32>
    %c240_i32 = arith.constant 240 : i32
    %56 = tpu.dynamic_rotate %2 by %c240_i32 dim 1 : vector<3x256xf32>, i32 -> vector<3x256xf32>
    %57 = vector.extract_strided_slice %0 {offsets = [7, 0], sizes = [1, 256], strides = [1, 1]} : vector<9x256xf32> to vector<1x256xf32>
    %58 = vector.broadcast %57 : vector<1x256xf32> to vector<3x256xf32>
    %59 = arith.mulf %56, %58 : vector<3x256xf32>
    %c7 = arith.constant 7 : index
    %c0_26 = arith.constant 0 : index
    %c0_27 = arith.constant 0 : index
    %60 = vector.load %arg3[%c7, %c0_26, %c0_27] : memref<9x16x3xf32, #tpu.memory_space<vmem>>, vector<1x16x3xf32>
    %61 = vector.shape_cast %60 : vector<1x16x3xf32> to vector<16x3xf32>
    %cst_28 = arith.constant dense<0.000000e+00> : vector<16x256xf32>
    %62 = tpu.matmul %61, %59, %cst_28 {dimension_numbers = #tpu.dot_dimension_numbers<[1], [0], [0], [1], [0, 0, 1, 1], [], []>} : vector<16x3xf32>, vector<3x256xf32>, vector<16x256xf32> -> vector<16x256xf32>
    %63 = arith.addf %55, %62 : vector<16x256xf32>
    %c239_i32 = arith.constant 239 : i32
    %64 = tpu.dynamic_rotate %2 by %c239_i32 dim 1 : vector<3x256xf32>, i32 -> vector<3x256xf32>
    %65 = vector.extract_strided_slice %0 {offsets = [8, 0], sizes = [1, 256], strides = [1, 1]} : vector<9x256xf32> to vector<1x256xf32>
    %66 = vector.broadcast %65 : vector<1x256xf32> to vector<3x256xf32>
    %67 = arith.mulf %64, %66 : vector<3x256xf32>
    %c8 = arith.constant 8 : index
    %c0_29 = arith.constant 0 : index
    %c0_30 = arith.constant 0 : index
    %68 = vector.load %arg3[%c8, %c0_29, %c0_30] : memref<9x16x3xf32, #tpu.memory_space<vmem>>, vector<1x16x3xf32>
    %69 = vector.shape_cast %68 : vector<1x16x3xf32> to vector<16x3xf32>
    %cst_31 = arith.constant dense<0.000000e+00> : vector<16x256xf32>
    %70 = tpu.matmul %69, %67, %cst_31 {dimension_numbers = #tpu.dot_dimension_numbers<[1], [0], [0], [1], [0, 0, 1, 1], [], []>} : vector<16x3xf32>, vector<3x256xf32>, vector<16x256xf32> -> vector<16x256xf32>
    %71 = arith.addf %63, %70 : vector<16x256xf32>
    %c0_32 = arith.constant 0 : index
    %c0_33 = arith.constant 0 : index
    %72 = vector.load %arg4[%c0_32, %c0_33] : memref<16x1xf32, #tpu.memory_space<vmem>>, vector<16x1xf32>
    %73 = vector.broadcast %72 : vector<16x1xf32> to vector<16x256xf32>
    %74 = arith.addf %71, %73 : vector<16x256xf32>
    %cst_34 = arith.constant 0.000000e+00 : f32
    %75 = vector.broadcast %cst_34 : f32 to vector<16x256xf32>
    %76 = arith.maximumf %74, %75 : vector<16x256xf32>
    %cst_35 = arith.constant 0.000000e+00 : f32
    %77 = vector.broadcast %cst_35 : f32 to vector<32x256xf32>
    %c17_i32_36 = arith.constant 17 : i32
    %78 = tpu.dynamic_rotate %76 by %c17_i32_36 dim 1 : vector<16x256xf32>, i32 -> vector<16x256xf32>
    %79 = vector.extract_strided_slice %0 {offsets = [0, 0], sizes = [1, 256], strides = [1, 1]} : vector<9x256xf32> to vector<1x256xf32>
    %80 = vector.broadcast %79 : vector<1x256xf32> to vector<16x256xf32>
    %81 = arith.mulf %78, %80 : vector<16x256xf32>
    %c0_37 = arith.constant 0 : index
    %c0_38 = arith.constant 0 : index
    %c0_39 = arith.constant 0 : index
    %82 = vector.load %arg5[%c0_37, %c0_38, %c0_39] : memref<9x32x16xf32, #tpu.memory_space<vmem>>, vector<1x32x16xf32>
    %83 = vector.shape_cast %82 : vector<1x32x16xf32> to vector<32x16xf32>
    %cst_40 = arith.constant dense<0.000000e+00> : vector<32x256xf32>
    %84 = tpu.matmul %83, %81, %cst_40 {dimension_numbers = #tpu.dot_dimension_numbers<[1], [0], [0], [1], [0, 0, 1, 1], [], []>} : vector<32x16xf32>, vector<16x256xf32>, vector<32x256xf32> -> vector<32x256xf32>
    %85 = arith.addf %77, %84 : vector<32x256xf32>
    %c16_i32_41 = arith.constant 16 : i32
    %86 = tpu.dynamic_rotate %76 by %c16_i32_41 dim 1 : vector<16x256xf32>, i32 -> vector<16x256xf32>
    %87 = vector.extract_strided_slice %0 {offsets = [1, 0], sizes = [1, 256], strides = [1, 1]} : vector<9x256xf32> to vector<1x256xf32>
    %88 = vector.broadcast %87 : vector<1x256xf32> to vector<16x256xf32>
    %89 = arith.mulf %86, %88 : vector<16x256xf32>
    %c1_42 = arith.constant 1 : index
    %c0_43 = arith.constant 0 : index
    %c0_44 = arith.constant 0 : index
    %90 = vector.load %arg5[%c1_42, %c0_43, %c0_44] : memref<9x32x16xf32, #tpu.memory_space<vmem>>, vector<1x32x16xf32>
    %91 = vector.shape_cast %90 : vector<1x32x16xf32> to vector<32x16xf32>
    %cst_45 = arith.constant dense<0.000000e+00> : vector<32x256xf32>
    %92 = tpu.matmul %91, %89, %cst_45 {dimension_numbers = #tpu.dot_dimension_numbers<[1], [0], [0], [1], [0, 0, 1, 1], [], []>} : vector<32x16xf32>, vector<16x256xf32>, vector<32x256xf32> -> vector<32x256xf32>
    %93 = arith.addf %85, %92 : vector<32x256xf32>
    %c15_i32_46 = arith.constant 15 : i32
    %94 = tpu.dynamic_rotate %76 by %c15_i32_46 dim 1 : vector<16x256xf32>, i32 -> vector<16x256xf32>
    %95 = vector.extract_strided_slice %0 {offsets = [2, 0], sizes = [1, 256], strides = [1, 1]} : vector<9x256xf32> to vector<1x256xf32>
    %96 = vector.broadcast %95 : vector<1x256xf32> to vector<16x256xf32>
    %97 = arith.mulf %94, %96 : vector<16x256xf32>
    %c2_47 = arith.constant 2 : index
    %c0_48 = arith.constant 0 : index
    %c0_49 = arith.constant 0 : index
    %98 = vector.load %arg5[%c2_47, %c0_48, %c0_49] : memref<9x32x16xf32, #tpu.memory_space<vmem>>, vector<1x32x16xf32>
    %99 = vector.shape_cast %98 : vector<1x32x16xf32> to vector<32x16xf32>
    %cst_50 = arith.constant dense<0.000000e+00> : vector<32x256xf32>
    %100 = tpu.matmul %99, %97, %cst_50 {dimension_numbers = #tpu.dot_dimension_numbers<[1], [0], [0], [1], [0, 0, 1, 1], [], []>} : vector<32x16xf32>, vector<16x256xf32>, vector<32x256xf32> -> vector<32x256xf32>
    %101 = arith.addf %93, %100 : vector<32x256xf32>
    %c1_i32_51 = arith.constant 1 : i32
    %102 = tpu.dynamic_rotate %76 by %c1_i32_51 dim 1 : vector<16x256xf32>, i32 -> vector<16x256xf32>
    %103 = vector.extract_strided_slice %0 {offsets = [3, 0], sizes = [1, 256], strides = [1, 1]} : vector<9x256xf32> to vector<1x256xf32>
    %104 = vector.broadcast %103 : vector<1x256xf32> to vector<16x256xf32>
    %105 = arith.mulf %102, %104 : vector<16x256xf32>
    %c3_52 = arith.constant 3 : index
    %c0_53 = arith.constant 0 : index
    %c0_54 = arith.constant 0 : index
    %106 = vector.load %arg5[%c3_52, %c0_53, %c0_54] : memref<9x32x16xf32, #tpu.memory_space<vmem>>, vector<1x32x16xf32>
    %107 = vector.shape_cast %106 : vector<1x32x16xf32> to vector<32x16xf32>
    %cst_55 = arith.constant dense<0.000000e+00> : vector<32x256xf32>
    %108 = tpu.matmul %107, %105, %cst_55 {dimension_numbers = #tpu.dot_dimension_numbers<[1], [0], [0], [1], [0, 0, 1, 1], [], []>} : vector<32x16xf32>, vector<16x256xf32>, vector<32x256xf32> -> vector<32x256xf32>
    %109 = arith.addf %101, %108 : vector<32x256xf32>
    %c4_56 = arith.constant 4 : index
    %c0_57 = arith.constant 0 : index
    %c0_58 = arith.constant 0 : index
    %110 = vector.load %arg5[%c4_56, %c0_57, %c0_58] : memref<9x32x16xf32, #tpu.memory_space<vmem>>, vector<1x32x16xf32>
    %111 = vector.shape_cast %110 : vector<1x32x16xf32> to vector<32x16xf32>
    %cst_59 = arith.constant dense<0.000000e+00> : vector<32x256xf32>
    %112 = tpu.matmul %111, %76, %cst_59 {dimension_numbers = #tpu.dot_dimension_numbers<[1], [0], [0], [1], [0, 0, 1, 1], [], []>} : vector<32x16xf32>, vector<16x256xf32>, vector<32x256xf32> -> vector<32x256xf32>
    %113 = arith.addf %109, %112 : vector<32x256xf32>
    %c255_i32_60 = arith.constant 255 : i32
    %114 = tpu.dynamic_rotate %76 by %c255_i32_60 dim 1 : vector<16x256xf32>, i32 -> vector<16x256xf32>
    %115 = vector.extract_strided_slice %0 {offsets = [5, 0], sizes = [1, 256], strides = [1, 1]} : vector<9x256xf32> to vector<1x256xf32>
    %116 = vector.broadcast %115 : vector<1x256xf32> to vector<16x256xf32>
    %117 = arith.mulf %114, %116 : vector<16x256xf32>
    %c5_61 = arith.constant 5 : index
    %c0_62 = arith.constant 0 : index
    %c0_63 = arith.constant 0 : index
    %118 = vector.load %arg5[%c5_61, %c0_62, %c0_63] : memref<9x32x16xf32, #tpu.memory_space<vmem>>, vector<1x32x16xf32>
    %119 = vector.shape_cast %118 : vector<1x32x16xf32> to vector<32x16xf32>
    %cst_64 = arith.constant dense<0.000000e+00> : vector<32x256xf32>
    %120 = tpu.matmul %119, %117, %cst_64 {dimension_numbers = #tpu.dot_dimension_numbers<[1], [0], [0], [1], [0, 0, 1, 1], [], []>} : vector<32x16xf32>, vector<16x256xf32>, vector<32x256xf32> -> vector<32x256xf32>
    %121 = arith.addf %113, %120 : vector<32x256xf32>
    %c241_i32_65 = arith.constant 241 : i32
    %122 = tpu.dynamic_rotate %76 by %c241_i32_65 dim 1 : vector<16x256xf32>, i32 -> vector<16x256xf32>
    %123 = vector.extract_strided_slice %0 {offsets = [6, 0], sizes = [1, 256], strides = [1, 1]} : vector<9x256xf32> to vector<1x256xf32>
    %124 = vector.broadcast %123 : vector<1x256xf32> to vector<16x256xf32>
    %125 = arith.mulf %122, %124 : vector<16x256xf32>
    %c6_66 = arith.constant 6 : index
    %c0_67 = arith.constant 0 : index
    %c0_68 = arith.constant 0 : index
    %126 = vector.load %arg5[%c6_66, %c0_67, %c0_68] : memref<9x32x16xf32, #tpu.memory_space<vmem>>, vector<1x32x16xf32>
    %127 = vector.shape_cast %126 : vector<1x32x16xf32> to vector<32x16xf32>
    %cst_69 = arith.constant dense<0.000000e+00> : vector<32x256xf32>
    %128 = tpu.matmul %127, %125, %cst_69 {dimension_numbers = #tpu.dot_dimension_numbers<[1], [0], [0], [1], [0, 0, 1, 1], [], []>} : vector<32x16xf32>, vector<16x256xf32>, vector<32x256xf32> -> vector<32x256xf32>
    %129 = arith.addf %121, %128 : vector<32x256xf32>
    %c240_i32_70 = arith.constant 240 : i32
    %130 = tpu.dynamic_rotate %76 by %c240_i32_70 dim 1 : vector<16x256xf32>, i32 -> vector<16x256xf32>
    %131 = vector.extract_strided_slice %0 {offsets = [7, 0], sizes = [1, 256], strides = [1, 1]} : vector<9x256xf32> to vector<1x256xf32>
    %132 = vector.broadcast %131 : vector<1x256xf32> to vector<16x256xf32>
    %133 = arith.mulf %130, %132 : vector<16x256xf32>
    %c7_71 = arith.constant 7 : index
    %c0_72 = arith.constant 0 : index
    %c0_73 = arith.constant 0 : index
    %134 = vector.load %arg5[%c7_71, %c0_72, %c0_73] : memref<9x32x16xf32, #tpu.memory_space<vmem>>, vector<1x32x16xf32>
    %135 = vector.shape_cast %134 : vector<1x32x16xf32> to vector<32x16xf32>
    %cst_74 = arith.constant dense<0.000000e+00> : vector<32x256xf32>
    %136 = tpu.matmul %135, %133, %cst_74 {dimension_numbers = #tpu.dot_dimension_numbers<[1], [0], [0], [1], [0, 0, 1, 1], [], []>} : vector<32x16xf32>, vector<16x256xf32>, vector<32x256xf32> -> vector<32x256xf32>
    %137 = arith.addf %129, %136 : vector<32x256xf32>
    %c239_i32_75 = arith.constant 239 : i32
    %138 = tpu.dynamic_rotate %76 by %c239_i32_75 dim 1 : vector<16x256xf32>, i32 -> vector<16x256xf32>
    %139 = vector.extract_strided_slice %0 {offsets = [8, 0], sizes = [1, 256], strides = [1, 1]} : vector<9x256xf32> to vector<1x256xf32>
    %140 = vector.broadcast %139 : vector<1x256xf32> to vector<16x256xf32>
    %141 = arith.mulf %138, %140 : vector<16x256xf32>
    %c8_76 = arith.constant 8 : index
    %c0_77 = arith.constant 0 : index
    %c0_78 = arith.constant 0 : index
    %142 = vector.load %arg5[%c8_76, %c0_77, %c0_78] : memref<9x32x16xf32, #tpu.memory_space<vmem>>, vector<1x32x16xf32>
    %143 = vector.shape_cast %142 : vector<1x32x16xf32> to vector<32x16xf32>
    %cst_79 = arith.constant dense<0.000000e+00> : vector<32x256xf32>
    %144 = tpu.matmul %143, %141, %cst_79 {dimension_numbers = #tpu.dot_dimension_numbers<[1], [0], [0], [1], [0, 0, 1, 1], [], []>} : vector<32x16xf32>, vector<16x256xf32>, vector<32x256xf32> -> vector<32x256xf32>
    %145 = arith.addf %137, %144 : vector<32x256xf32>
    %c0_80 = arith.constant 0 : index
    %c0_81 = arith.constant 0 : index
    %146 = vector.load %arg6[%c0_80, %c0_81] : memref<32x1xf32, #tpu.memory_space<vmem>>, vector<32x1xf32>
    %147 = vector.broadcast %146 : vector<32x1xf32> to vector<32x256xf32>
    %148 = arith.addf %145, %147 : vector<32x256xf32>
    %cst_82 = arith.constant 0.000000e+00 : f32
    %149 = vector.broadcast %cst_82 : f32 to vector<32x256xf32>
    %150 = arith.maximumf %148, %149 : vector<32x256xf32>
    %cst_83 = arith.constant 0.000000e+00 : f32
    %151 = vector.broadcast %cst_83 : f32 to vector<3x256xf32>
    %c17_i32_84 = arith.constant 17 : i32
    %152 = tpu.dynamic_rotate %150 by %c17_i32_84 dim 1 : vector<32x256xf32>, i32 -> vector<32x256xf32>
    %153 = vector.extract_strided_slice %0 {offsets = [0, 0], sizes = [1, 256], strides = [1, 1]} : vector<9x256xf32> to vector<1x256xf32>
    %154 = vector.broadcast %153 : vector<1x256xf32> to vector<32x256xf32>
    %155 = arith.mulf %152, %154 : vector<32x256xf32>
    %c0_85 = arith.constant 0 : index
    %c0_86 = arith.constant 0 : index
    %c0_87 = arith.constant 0 : index
    %156 = vector.load %arg7[%c0_85, %c0_86, %c0_87] : memref<9x3x32xf32, #tpu.memory_space<vmem>>, vector<1x3x32xf32>
    %157 = vector.shape_cast %156 : vector<1x3x32xf32> to vector<3x32xf32>
    %cst_88 = arith.constant dense<0.000000e+00> : vector<3x256xf32>
    %158 = tpu.matmul %157, %155, %cst_88 {dimension_numbers = #tpu.dot_dimension_numbers<[1], [0], [0], [1], [0, 0, 1, 1], [], []>} : vector<3x32xf32>, vector<32x256xf32>, vector<3x256xf32> -> vector<3x256xf32>
    %159 = arith.addf %151, %158 : vector<3x256xf32>
    %c16_i32_89 = arith.constant 16 : i32
    %160 = tpu.dynamic_rotate %150 by %c16_i32_89 dim 1 : vector<32x256xf32>, i32 -> vector<32x256xf32>
    %161 = vector.extract_strided_slice %0 {offsets = [1, 0], sizes = [1, 256], strides = [1, 1]} : vector<9x256xf32> to vector<1x256xf32>
    %162 = vector.broadcast %161 : vector<1x256xf32> to vector<32x256xf32>
    %163 = arith.mulf %160, %162 : vector<32x256xf32>
    %c1_90 = arith.constant 1 : index
    %c0_91 = arith.constant 0 : index
    %c0_92 = arith.constant 0 : index
    %164 = vector.load %arg7[%c1_90, %c0_91, %c0_92] : memref<9x3x32xf32, #tpu.memory_space<vmem>>, vector<1x3x32xf32>
    %165 = vector.shape_cast %164 : vector<1x3x32xf32> to vector<3x32xf32>
    %cst_93 = arith.constant dense<0.000000e+00> : vector<3x256xf32>
    %166 = tpu.matmul %165, %163, %cst_93 {dimension_numbers = #tpu.dot_dimension_numbers<[1], [0], [0], [1], [0, 0, 1, 1], [], []>} : vector<3x32xf32>, vector<32x256xf32>, vector<3x256xf32> -> vector<3x256xf32>
    %167 = arith.addf %159, %166 : vector<3x256xf32>
    %c15_i32_94 = arith.constant 15 : i32
    %168 = tpu.dynamic_rotate %150 by %c15_i32_94 dim 1 : vector<32x256xf32>, i32 -> vector<32x256xf32>
    %169 = vector.extract_strided_slice %0 {offsets = [2, 0], sizes = [1, 256], strides = [1, 1]} : vector<9x256xf32> to vector<1x256xf32>
    %170 = vector.broadcast %169 : vector<1x256xf32> to vector<32x256xf32>
    %171 = arith.mulf %168, %170 : vector<32x256xf32>
    %c2_95 = arith.constant 2 : index
    %c0_96 = arith.constant 0 : index
    %c0_97 = arith.constant 0 : index
    %172 = vector.load %arg7[%c2_95, %c0_96, %c0_97] : memref<9x3x32xf32, #tpu.memory_space<vmem>>, vector<1x3x32xf32>
    %173 = vector.shape_cast %172 : vector<1x3x32xf32> to vector<3x32xf32>
    %cst_98 = arith.constant dense<0.000000e+00> : vector<3x256xf32>
    %174 = tpu.matmul %173, %171, %cst_98 {dimension_numbers = #tpu.dot_dimension_numbers<[1], [0], [0], [1], [0, 0, 1, 1], [], []>} : vector<3x32xf32>, vector<32x256xf32>, vector<3x256xf32> -> vector<3x256xf32>
    %175 = arith.addf %167, %174 : vector<3x256xf32>
    %c1_i32_99 = arith.constant 1 : i32
    %176 = tpu.dynamic_rotate %150 by %c1_i32_99 dim 1 : vector<32x256xf32>, i32 -> vector<32x256xf32>
    %177 = vector.extract_strided_slice %0 {offsets = [3, 0], sizes = [1, 256], strides = [1, 1]} : vector<9x256xf32> to vector<1x256xf32>
    %178 = vector.broadcast %177 : vector<1x256xf32> to vector<32x256xf32>
    %179 = arith.mulf %176, %178 : vector<32x256xf32>
    %c3_100 = arith.constant 3 : index
    %c0_101 = arith.constant 0 : index
    %c0_102 = arith.constant 0 : index
    %180 = vector.load %arg7[%c3_100, %c0_101, %c0_102] : memref<9x3x32xf32, #tpu.memory_space<vmem>>, vector<1x3x32xf32>
    %181 = vector.shape_cast %180 : vector<1x3x32xf32> to vector<3x32xf32>
    %cst_103 = arith.constant dense<0.000000e+00> : vector<3x256xf32>
    %182 = tpu.matmul %181, %179, %cst_103 {dimension_numbers = #tpu.dot_dimension_numbers<[1], [0], [0], [1], [0, 0, 1, 1], [], []>} : vector<3x32xf32>, vector<32x256xf32>, vector<3x256xf32> -> vector<3x256xf32>
    %183 = arith.addf %175, %182 : vector<3x256xf32>
    %c4_104 = arith.constant 4 : index
    %c0_105 = arith.constant 0 : index
    %c0_106 = arith.constant 0 : index
    %184 = vector.load %arg7[%c4_104, %c0_105, %c0_106] : memref<9x3x32xf32, #tpu.memory_space<vmem>>, vector<1x3x32xf32>
    %185 = vector.shape_cast %184 : vector<1x3x32xf32> to vector<3x32xf32>
    %cst_107 = arith.constant dense<0.000000e+00> : vector<3x256xf32>
    %186 = tpu.matmul %185, %150, %cst_107 {dimension_numbers = #tpu.dot_dimension_numbers<[1], [0], [0], [1], [0, 0, 1, 1], [], []>} : vector<3x32xf32>, vector<32x256xf32>, vector<3x256xf32> -> vector<3x256xf32>
    %187 = arith.addf %183, %186 : vector<3x256xf32>
    %c255_i32_108 = arith.constant 255 : i32
    %188 = tpu.dynamic_rotate %150 by %c255_i32_108 dim 1 : vector<32x256xf32>, i32 -> vector<32x256xf32>
    %189 = vector.extract_strided_slice %0 {offsets = [5, 0], sizes = [1, 256], strides = [1, 1]} : vector<9x256xf32> to vector<1x256xf32>
    %190 = vector.broadcast %189 : vector<1x256xf32> to vector<32x256xf32>
    %191 = arith.mulf %188, %190 : vector<32x256xf32>
    %c5_109 = arith.constant 5 : index
    %c0_110 = arith.constant 0 : index
    %c0_111 = arith.constant 0 : index
    %192 = vector.load %arg7[%c5_109, %c0_110, %c0_111] : memref<9x3x32xf32, #tpu.memory_space<vmem>>, vector<1x3x32xf32>
    %193 = vector.shape_cast %192 : vector<1x3x32xf32> to vector<3x32xf32>
    %cst_112 = arith.constant dense<0.000000e+00> : vector<3x256xf32>
    %194 = tpu.matmul %193, %191, %cst_112 {dimension_numbers = #tpu.dot_dimension_numbers<[1], [0], [0], [1], [0, 0, 1, 1], [], []>} : vector<3x32xf32>, vector<32x256xf32>, vector<3x256xf32> -> vector<3x256xf32>
    %195 = arith.addf %187, %194 : vector<3x256xf32>
    %c241_i32_113 = arith.constant 241 : i32
    %196 = tpu.dynamic_rotate %150 by %c241_i32_113 dim 1 : vector<32x256xf32>, i32 -> vector<32x256xf32>
    %197 = vector.extract_strided_slice %0 {offsets = [6, 0], sizes = [1, 256], strides = [1, 1]} : vector<9x256xf32> to vector<1x256xf32>
    %198 = vector.broadcast %197 : vector<1x256xf32> to vector<32x256xf32>
    %199 = arith.mulf %196, %198 : vector<32x256xf32>
    %c6_114 = arith.constant 6 : index
    %c0_115 = arith.constant 0 : index
    %c0_116 = arith.constant 0 : index
    %200 = vector.load %arg7[%c6_114, %c0_115, %c0_116] : memref<9x3x32xf32, #tpu.memory_space<vmem>>, vector<1x3x32xf32>
    %201 = vector.shape_cast %200 : vector<1x3x32xf32> to vector<3x32xf32>
    %cst_117 = arith.constant dense<0.000000e+00> : vector<3x256xf32>
    %202 = tpu.matmul %201, %199, %cst_117 {dimension_numbers = #tpu.dot_dimension_numbers<[1], [0], [0], [1], [0, 0, 1, 1], [], []>} : vector<3x32xf32>, vector<32x256xf32>, vector<3x256xf32> -> vector<3x256xf32>
    %203 = arith.addf %195, %202 : vector<3x256xf32>
    %c240_i32_118 = arith.constant 240 : i32
    %204 = tpu.dynamic_rotate %150 by %c240_i32_118 dim 1 : vector<32x256xf32>, i32 -> vector<32x256xf32>
    %205 = vector.extract_strided_slice %0 {offsets = [7, 0], sizes = [1, 256], strides = [1, 1]} : vector<9x256xf32> to vector<1x256xf32>
    %206 = vector.broadcast %205 : vector<1x256xf32> to vector<32x256xf32>
    %207 = arith.mulf %204, %206 : vector<32x256xf32>
    %c7_119 = arith.constant 7 : index
    %c0_120 = arith.constant 0 : index
    %c0_121 = arith.constant 0 : index
    %208 = vector.load %arg7[%c7_119, %c0_120, %c0_121] : memref<9x3x32xf32, #tpu.memory_space<vmem>>, vector<1x3x32xf32>
    %209 = vector.shape_cast %208 : vector<1x3x32xf32> to vector<3x32xf32>
    %cst_122 = arith.constant dense<0.000000e+00> : vector<3x256xf32>
    %210 = tpu.matmul %209, %207, %cst_122 {dimension_numbers = #tpu.dot_dimension_numbers<[1], [0], [0], [1], [0, 0, 1, 1], [], []>} : vector<3x32xf32>, vector<32x256xf32>, vector<3x256xf32> -> vector<3x256xf32>
    %211 = arith.addf %203, %210 : vector<3x256xf32>
    %c239_i32_123 = arith.constant 239 : i32
    %212 = tpu.dynamic_rotate %150 by %c239_i32_123 dim 1 : vector<32x256xf32>, i32 -> vector<32x256xf32>
    %213 = vector.extract_strided_slice %0 {offsets = [8, 0], sizes = [1, 256], strides = [1, 1]} : vector<9x256xf32> to vector<1x256xf32>
    %214 = vector.broadcast %213 : vector<1x256xf32> to vector<32x256xf32>
    %215 = arith.mulf %212, %214 : vector<32x256xf32>
    %c8_124 = arith.constant 8 : index
    %c0_125 = arith.constant 0 : index
    %c0_126 = arith.constant 0 : index
    %216 = vector.load %arg7[%c8_124, %c0_125, %c0_126] : memref<9x3x32xf32, #tpu.memory_space<vmem>>, vector<1x3x32xf32>
    %217 = vector.shape_cast %216 : vector<1x3x32xf32> to vector<3x32xf32>
    %cst_127 = arith.constant dense<0.000000e+00> : vector<3x256xf32>
    %218 = tpu.matmul %217, %215, %cst_127 {dimension_numbers = #tpu.dot_dimension_numbers<[1], [0], [0], [1], [0, 0, 1, 1], [], []>} : vector<3x32xf32>, vector<32x256xf32>, vector<3x256xf32> -> vector<3x256xf32>
    %219 = arith.addf %211, %218 : vector<3x256xf32>
    %c0_128 = arith.constant 0 : index
    %c0_129 = arith.constant 0 : index
    %220 = vector.load %arg8[%c0_128, %c0_129] : memref<3x1xf32, #tpu.memory_space<vmem>>, vector<3x1xf32>
    %221 = vector.broadcast %220 : vector<3x1xf32> to vector<3x256xf32>
    %222 = arith.addf %219, %221 : vector<3x256xf32>
    %c0_130 = arith.constant 0 : index
    %c0_131 = arith.constant 0 : index
    %c0_132 = arith.constant 0 : index
    %223 = vector.load %arg9[%c0_130, %c0_131, %c0_132] : memref<1x3x256xf32, #tpu.memory_space<vmem>>, vector<1x3x256xf32>
    %224 = vector.shape_cast %223 : vector<1x3x256xf32> to vector<3x256xf32>
    %225 = vector.shape_cast %222 : vector<3x256xf32> to vector<1x3x256xf32>
    tpu.vector_store %arg9[%c0_130, %c0_131, %c0_132], %225 {strides = array<i32>} : memref<1x3x256xf32, #tpu.memory_space<vmem>>, vector<1x3x256xf32>,
    return
  }
  func.func @transform_0(%arg0: i32) -> (i32, i32, i32) {
    %c0_i32 = arith.constant 0 : i32
    %c0_i32_0 = arith.constant 0 : i32
    %c0_i32_1 = arith.constant 0 : i32
    return %arg0, %c0_i32, %c0_i32_0 : i32, i32, i32
  }
  func.func @transform_1(%arg0: i32) -> (i32, i32) {
    %c0_i32 = arith.constant 0 : i32
    %c0_i32_0 = arith.constant 0 : i32
    %c0_i32_1 = arith.constant 0 : i32
    return %c0_i32, %c0_i32_0 : i32, i32
  }
  func.func @transform_2(%arg0: i32) -> (i32, i32, i32) {
    %c0_i32 = arith.constant 0 : i32
    %c0_i32_0 = arith.constant 0 : i32
    %c0_i32_1 = arith.constant 0 : i32
    %c0_i32_2 = arith.constant 0 : i32
    return %c0_i32, %c0_i32_0, %c0_i32_1 : i32, i32, i32
  }
  func.func @transform_3(%arg0: i32) -> (i32, i32) {
    %c0_i32 = arith.constant 0 : i32
    %c0_i32_0 = arith.constant 0 : i32
    %c0_i32_1 = arith.constant 0 : i32
    return %c0_i32, %c0_i32_0 : i32, i32
  }
  func.func @transform_4(%arg0: i32) -> (i32, i32, i32) {
    %c0_i32 = arith.constant 0 : i32
    %c0_i32_0 = arith.constant 0 : i32
    %c0_i32_1 = arith.constant 0 : i32
    %c0_i32_2 = arith.constant 0 : i32
    return %c0_i32, %c0_i32_0, %c0_i32_1 : i32, i32, i32
  }
  func.func @transform_5(%arg0: i32) -> (i32, i32) {
    %c0_i32 = arith.constant 0 : i32
    %c0_i32_0 = arith.constant 0 : i32
    %c0_i32_1 = arith.constant 0 : i32
    return %c0_i32, %c0_i32_0 : i32, i32
  }
  func.func @transform_6(%arg0: i32) -> (i32, i32, i32) {
    %c0_i32 = arith.constant 0 : i32
    %c0_i32_0 = arith.constant 0 : i32
    %c0_i32_1 = arith.constant 0 : i32
    %c0_i32_2 = arith.constant 0 : i32
    return %c0_i32, %c0_i32_0, %c0_i32_1 : i32, i32, i32
  }
  func.func @transform_7(%arg0: i32) -> (i32, i32) {
    %c0_i32 = arith.constant 0 : i32
    %c0_i32_0 = arith.constant 0 : i32
    %c0_i32_1 = arith.constant 0 : i32
    return %c0_i32, %c0_i32_0 : i32, i32
  }
  func.func @transform_8(%arg0: i32) -> (i32, i32, i32) {
    %c0_i32 = arith.constant 0 : i32
    %c0_i32_0 = arith.constant 0 : i32
    %c0_i32_1 = arith.constant 0 : i32
    return %arg0, %c0_i32, %c0_i32_0 : i32, i32, i32
  }
}

</mosaic_0001>

<bundles_post_ra>
// kernel: tpu_custom_call.1
= control target key start
LH: loop header
LB: loop body
LE: loop exit
PB: predicated region body
PF: predicated region fallthrough
CT: control target
= control target key end

     0   :  { %s3985_s27 = smov 0   ;;  %s5169_s0 = inlined_call_operand.vmem [shape: f32[2,3,256], index: 0, kind: input, shape index: {}]   ;;  %s5170_s1 = inlined_call_operand.vmem [shape: f32[9,256], index: 1, kind: input, shape index: {}]   ;;  %s5171_s2 = inlined_call_operand.vmem [shape: f32[9,16,3], index: 2, kind: input, shape index: {}]   ;;  %s5172_s3 = inlined_call_operand.vmem [shape: f32[16,1], index: 3, kind: input, shape index: {}]   ;;  %s5173_s4 = inlined_call_operand.vmem [shape: f32[9,32,16], index: 4, kind: input, shape index: {}]   ;;  %s5174_s5 = inlined_call_operand.vmem [shape: f32[32,1], index: 5, kind: input, shape index: {}]   ;;  %s5175_s6 = inlined_call_operand.vmem [shape: f32[9,3,32], index: 6, kind: input, shape index: {}]   ;;  %s5176_s7 = inlined_call_operand.vmem [shape: f32[3,1], index: 7, kind: input, shape index: {}]   ;;  %s5177_s8 = inlined_call_operand.vmem [shape: f32[2,3,256], index: 8, kind: output, shape index: {}]  }
   0x1 LB: > { %s3527_s28 = sadd.s32 4294967295, %s3928_s27   ;;  %p3531_p0 = scmp.ge.s32.totalorder %s3928_s27, 1  ;;  %s3928_s27 = sphi %s3985_s27, %s18_s27  }
   0x2   : > { %p262_p1 = scmp.lt.s32.totalorder %s3928_s27, 3 }
   0x4   : > { %p263_p2 = pnand %p3531_p0, %p262_p1 }
   0x6   : > { %266 = sbr.rel (%p263_p2) target bundleno = 1369 (0x559), region = 52 }
   0xd   : > { %p296_p3 = scmp.lt.s32.totalorder %s3527_s28, 1  ;;  %v5178_v0 = vmov 0.0   ;;  %s3931_s11 = smov 16   ;;  %v1307_v3 = vld [vmem:[%s5172_s3] sm:$0xff]  ;;  %v1308_v4 = vld [vmem:[%s5172_s3 + $0x8] sm:$0xff]  ;;  %v3939_v5 = vmov 0   ;;  %v318_v6 = vlaneseq }
   0xe   : > { %433 = vmatprep.mubr.f32.mxu0 %v5178_v0  ;;  %1445 = vmatprep.mubr.f32.mxu1 %v5178_v0  ;;  %s3932_s12 = smov 17   ;;  %s3933_s13 = smov 15   ;;  %v4056_v11 = vld [vmem:[%s5170_s1] sm:$0xff]  ;;  %v4061_v12 = vld [vmem:[%s5170_s1 + $0x8] sm:$0xff]  ;;  %vm362_vm2 = vcmask 1042432   ;;  %v3536_v31 = vld [vmem:[%s5171_s2 + $0x10] sm:$0xff] }
   0xf   : > { %s5195_s28 = smov (!%p296_p3, %s3527_s28), 1  ;;  %s3934_s14 = smov 1   ;;  %3917 = vset.pattern.permute.xlu0 %v3939_v5  ;;  %3918 = vset.pattern.permute.xlu1 %v3939_v5  ;;  %v4047_v7 = vshrl.u32 %v318_v6, 7  ;;  %v4049_v8 = vand.u32 127, %v318_v6  ;;  %vm355_vm4 = vcmask 23552   ;;  %v3537_v37 = vld [vmem:[%s5171_s2 + $0x18] sm:$0xff] }
  0x10   : > { %s3677_s29 = sshll.u32 %s5195_s28, 3  ;;  %s3935_s15 = smov 127   ;;  %v333_v45 = vld [vmem:[%s5171_s2] sm:$0xff]  ;;  %v334_v47 = vld [vmem:[%s5171_s2 + $0x8] sm:$0xff]  ;;  %v3552_v58 = vld [vmem:[%s5171_s2 + $0x30] sm:$0xff]  ;;  %vm1368_vm10 = vcmask 130048  }
  0x11   : > { %s300_s10 = scalar_lea.vmem %s5169_s0, %s3677_s29  ;;  %s3936_s16 = smov 113   ;;  %v325_v9 = vsub.s32 0, %v4047_v7  ;;  %v344_v10 = vsub.s32 1, %v4047_v7  ;;  %vm339_vm0 = vcmp.lt.s32.totalorder %v4049_v8, 16  ;;  %vm320_vm1 = vcmp.lt.s32.totalorder %v4049_v8, 17  ;;  %v3546_v51 = vld [vmem:[%s5171_s2 + $0x20] sm:$0xff] }
  0x12   : > { %v4003_v1 = vld [vmem:[%s300_s10] sm:$0x77]  ;;  %s3937_s17 = smov 112   ;;  %s3938_s18 = smov 111   ;;  %v544_v18 = vsub.s32 2, %v4047_v7  ;;  %vm539_vm3 = vcmp.lt.s32.totalorder %v4049_v8, 15 }
  0x13   : > { %335 = vrot.lane.b32.xlu0 %v4003_v1, %s3931_s11  ;;  %314 = vrot.lane.b32.xlu1 %v4003_v1, %s3932_s12  ;;  %v4011_v2 = vcombine.high %v4003_v1, %v4003_v1  ;;  %v4066_v15 = vrot.slane %v4061_v12, %v325_v9  ;;  %v4069_v16 = vrot.slane %v4061_v12, %v344_v10  ;;  %v657_v34 = vsub.s32 3, %v4047_v7  ;;  %v3547_v55 = vld [vmem:[%s5171_s2 + $0x28] sm:$0xff]  ;;  %v3553_v63 = vld [vmem:[%s5171_s2 + $0x38] sm:$0xff] }
  0x14   : > { %v4072_v17 = vrot.slane %v4056_v11, %v344_v10  ;;  %v4076_v19 = vrot.slane %v4056_v11, %v325_v9  ;;  %v4091_v29 = vrot.slane %v4061_v12, %v544_v18  ;;  %vm652_vm5 = vcmp.lt.s32.totalorder %v4049_v8, 1  ;;  %v3558_v6 = vld [vmem:[%s5171_s2 + $0x40] sm:$0xff] }
  0x15   : > { %v4112_v38 = vrot.slane %v4056_v11, %v544_v18  ;;  %v4118_v41 = vrot.slane %v4061_v12, %v657_v34  ;;  %v4136_v48 = vrot.slane %v4056_v11, %v657_v34  ;;  %v864_v52 = vsub.s32 5, %v4047_v7  ;;  %v3559_v18 = vld [vmem:[%s5171_s2 + $0x48] sm:$0xff] }
  0x16   : > { %vm859_vm6 = vcmp.lt.s32.totalorder %v4049_v8, 127  ;;  %v977_v60 = vsub.s32 6, %v4047_v7  ;;  %vm972_vm7 = vcmp.lt.s32.totalorder %v4049_v8, 113  ;;  %v1090_v10 = vsub.s32 7, %v4047_v7 }
  0x17   : > { %337 = vrot.lane.b32.xlu0 %v4011_v2, %s3931_s11  ;;  %316 = vrot.lane.b32.xlu1 %v4011_v2, %s3932_s12  ;;  %v4158_v56 = vrot.slane %v4061_v12, %v864_v52  ;;  %vm1085_vm8 = vcmp.lt.s32.totalorder %v4049_v8, 112  ;;  %vm1198_vm9 = vcmp.lt.s32.totalorder %v4049_v8, 111  ;;  %vm2572_vm11 = vcmask 261120  }
  0x1b   : > { %537 = vrot.lane.b32.xlu1 %v4011_v2, %s3933_s13  ;;  %535 = vrot.lane.b32.xlu0 %v4003_v1, %s3933_s13 }
  0x1f   : > { %650 = vrot.lane.b32.xlu1 %v4011_v2, %s3934_s14  ;;  %648 = vrot.lane.b32.xlu0 %v4003_v1, %s3934_s14 }
  0x23   : > { %857 = vrot.lane.b32.xlu1 %v4011_v2, %s3935_s15  ;;  %855 = vrot.lane.b32.xlu0 %v4003_v1, %s3935_s15 }
  0x27   : > { %970 = vrot.lane.b32.xlu1 %v4011_v2, %s3936_s16  ;;  %968 = vrot.lane.b32.xlu0 %v4003_v1, %s3936_s16 }
  0x2b   : > { %1083 = vrot.lane.b32.xlu1 %v4011_v2, %s3937_s17  ;;  %1081 = vrot.lane.b32.xlu0 %v4003_v1, %s3937_s17 }
  0x2f   : > { %1196 = vrot.lane.b32.xlu1 %v4011_v2, %s3938_s18  ;;  %1194 = vrot.lane.b32.xlu0 %v4003_v1, %s3938_s18 }
  0x33   : > { %1311 = vperm.xlu0 %3917, %v1307_v3   ;;  %1316 = vperm.xlu1 %3918, %v1308_v4   ;;  %v4184_v4 = vrot.slane %v4061_v12, %v977_v60 }
  0x85   : > { %v336_v13 = vpop.permute.xlu0 %335  ;;  %v315_v14 = vpop.permute.xlu1 %314 }
  0x89   : > { %v338_v20 = vpop.permute.xlu0 %337  ;;  %v317_v21 = vpop.permute.xlu1 %316 }
  0x8a   : > { %v341_v22 = vsel %vm339_vm0, %v338_v20, %v336_v13  ;;  %v321_v23 = vsel %vm320_vm1, %v315_v14, %v317_v21  ;;  %v322_v24 = vsel %vm320_vm1, %v317_v21, %v315_v14  ;;  %v340_v25 = vsel %vm339_vm0, %v336_v13, %v338_v20 }
  0x8b   : > { %v332_v26 = vmul.f32 %v4066_v15, %v321_v23  ;;  %v351_v27 = vmul.f32 %v4069_v16, %v340_v25  ;;  %v350_v28 = vmul.f32 %v4072_v17, %v341_v22  ;;  %v331_v30 = vmul.f32 %v4076_v19, %v322_v24  ;;  %v3564_v24 = vld [vmem:[%s5171_s2 + $0x50] sm:$0xff] }
  0x8c   : > { %v4204_v20 = vrot.slane %v4056_v11, %v977_v60  ;;  %v4210_v21 = vrot.slane %v4061_v12, %v1090_v10 }
  0x8d   : > { %3538 = vmatprep.subr.msk.mxu0 %vm362_vm2, %v351_v27  ;;  %v538_v32 = vpop.permute.xlu1 %537  ;;  %v536_v33 = vpop.permute.xlu0 %535  ;;  %v3565_v27 = vld [vmem:[%s5171_s2 + $0x58] sm:$0xff] }
  0x8e   : > { %3539 = vmatpush1.msk.msra.mxu0 %vm362_vm2, %v350_v28  ;;  %v540_v35 = vsel %vm539_vm3, %v536_v33, %v538_v32  ;;  %v541_v39 = vsel %vm539_vm3, %v538_v32, %v536_v33  ;;  %5184 = vst [vmem:[#allocation2_spill] sm:$0xff] %v4210_v21  ;;  %v4229_v28 = vrot.slane %v4056_v11, %v1090_v10  ;;  %v3570_v33 = vld [vmem:[%s5171_s2 + $0x60] sm:$0xff] }
  0x8f   : > { %3540 = vmatmul.mubr.msk.f32.vlgmr.msra.gmra.mrb[0].mxu0 %vm355_vm4, %v3536_v31  ;;  %3542 = vmatprep.subr.msk.mxu0 %vm362_vm2, %v332_v26  ;;  %v551_v36 = vmul.f32 %v4091_v29, %v540_v35  ;;  %v550_v44 = vmul.f32 %v4112_v38, %v541_v39  ;;  %v4237_v31 = vld [vmem:[%s5170_s1 + $0x18] ss:$0 sm:$0xff]  ;;  %v3571_v35 = vld [vmem:[%s5171_s2 + $0x68] sm:$0xff] }
  0x90   : > { %3543 = vmatpush1.msk.msra.mxu0 %vm362_vm2, %v331_v30  ;;  %439 = vmatprep.mubr.f32.mxu0 %v5178_v0  ;;  %5185 = vst [vmem:[#allocation3_spill] sm:$0xff] %v4229_v28 }
  0x91   : > { %3548 = vmatprep.subr.msk.mxu0 %vm362_vm2, %v551_v36  ;;  %v651_v40 = vpop.permute.xlu1 %650  ;;  %v649_v42 = vpop.permute.xlu0 %648  ;;  %v4257_v36 = vld [vmem:[%s5170_s1 + $0x10] ss:$0 sm:$0xff] }
  0x92   : > { %v653_v43 = vsel %vm652_vm5, %v649_v42, %v651_v40  ;;  %v654_v49 = vsel %vm652_vm5, %v651_v40, %v649_v42  ;;  %v3576_v40 = vld [vmem:[%s5171_s2 + $0x70] sm:$0xff]  ;;  %v3577_v42 = vld [vmem:[%s5171_s2 + $0x78] sm:$0xff] }
  0x93   : > { %3541 = vmatmul.mubr.msk.f32.gmra.mrb[2].mxu0 %vm355_vm4, %v3537_v37  ;;  %v664_v46 = vmul.f32 %v4118_v41, %v653_v43  ;;  %v663_v50 = vmul.f32 %v4136_v48, %v654_v49  ;;  %v3584_v43 = vld [vmem:[%s5171_s2 + $0x80] sm:$0xff] }
  0x94   : > { %522 = vmatprep.mubr.f32.mxu0 %v5178_v0 }
  0x95   : > { %v858_v53 = vpop.permute.xlu1 %857  ;;  %v856_v54 = vpop.permute.xlu0 %855 }
  0x96   : > { %v861_v57 = vsel %vm859_vm6, %v858_v53, %v856_v54  ;;  %v860_v3 = vsel %vm859_vm6, %v856_v54, %v858_v53 }
  0x97   : > { %3544 = vmatmul.mubr.msk.f32.vlgmr.msra.gmra.mrb[0].mxu0 %vm355_vm4, %v333_v45  ;;  %v871_v59 = vmul.f32 %v4158_v56, %v861_v57 }
  0x98   : > { %528 = vmatprep.mubr.f32.mxu0 %v5178_v0  ;;  %3549 = vmatpush1.msk.msra.mxu0 %vm362_vm2, %v550_v44  ;;  %v3585_v44 = vld [vmem:[%s5171_s2 + $0x88] sm:$0xff] }
  0x99   : > { %3554 = vmatprep.subr.msk.mxu0 %vm362_vm2, %v664_v46  ;;  %v971_v61 = vpop.permute.xlu1 %970  ;;  %v969_v62 = vpop.permute.xlu0 %968 }
  0x9a   : > { %v974_v5 = vsel %vm972_vm7, %v971_v61, %v969_v62  ;;  %v973_v7 = vsel %vm972_vm7, %v969_v62, %v971_v61 }
  0x9b   : > { %3545 = vmatmul.mubr.msk.f32.gmra.mrb[2].mxu0 %vm355_vm4, %v334_v47  ;;  %v984_v9 = vmul.f32 %v4184_v4, %v974_v5  ;;  %v983_v23 = vmul.f32 %v4204_v20, %v973_v7  ;;  %v2467_v5 = vld [vmem:[%s5174_s5 + $0x10] sm:$0xff] }
  0x9c   : > { %631 = vmatprep.mubr.f32.mxu0 %v5178_v0 }
  0x9d   : > { %v1084_v13 = vpop.permute.xlu1 %1083  ;;  %v1082_v14 = vpop.permute.xlu0 %1081 }
  0x9e   : > { %v1087_v22 = vsel %vm1085_vm8, %v1084_v13, %v1082_v14  ;;  %v1086_v30 = vsel %vm1085_vm8, %v1082_v14, %v1084_v13 }
  0x9f   : > { %3550 = vmatmul.mubr.msk.f32.vlgmr.msra.gmra.mrb[0].mxu0 %vm355_vm4, %v3546_v51  ;;  %v1097_v25 = vmul.f32 %v4210_v21, %v1087_v22 }
  0xa0   : > { %637 = vmatprep.mubr.f32.mxu0 %v5178_v0  ;;  %3555 = vmatpush1.msk.msra.mxu0 %vm362_vm2, %v663_v50 }
  0xa1   : > { %3560 = vmatprep.subr.msk.mxu0 %vm362_vm2, %v4011_v2  ;;  %v4178_v2 = vrot.slane %v4056_v11, %v864_v52  ;;  %v1197_v26 = vpop.permute.xlu1 %1196  ;;  %v1195_v12 = vpop.permute.xlu0 %1194  ;;  %v1096_v11 = vmul.f32 %v4229_v28, %v1086_v30 }
  0xa2   : > { %v1200_v32 = vsel %vm1198_vm9, %v1197_v26, %v1195_v12  ;;  %v1199_v37 = vsel %vm1198_vm9, %v1195_v12, %v1197_v26 }
  0xa3   : > { %3551 = vmatmul.mubr.msk.f32.gmra.mrb[2].mxu0 %vm355_vm4, %v3547_v55  ;;  %v1210_v34 = vmul.f32 %v4237_v31, %v1200_v32  ;;  %v1209_v39 = vmul.f32 %v4257_v36, %v1199_v37 }
  0xa4   : > { %744 = vmatprep.mubr.f32.mxu0 %v5178_v0 }
  0xa7   : > { %3556 = vmatmul.mubr.msk.f32.vlgmr.msra.gmra.mrb[0].mxu0 %vm355_vm4, %v3552_v58 }
  0xa8   : > { %750 = vmatprep.mubr.f32.mxu0 %v5178_v0  ;;  %3561 = vmatpush1.msk.msra.mxu0 %vm362_vm2, %v4003_v1  ;;  %v870_v1 = vmul.f32 %v4178_v2, %v860_v3  ;;  %v2466_v3 = vld [vmem:[%s5174_s5 + $0x8] sm:$0xff] }
  0xa9   : > { %3566 = vmatprep.subr.msk.mxu0 %vm362_vm2, %v871_v59 }
  0xab   : > { %3557 = vmatmul.mubr.msk.f32.gmra.mrb[2].mxu0 %vm355_vm4, %v3553_v63  ;;  %v2465_v63 = vld [vmem:[%s5174_s5] sm:$0xff] }
  0xac   : > { %838 = vmatprep.mubr.f32.mxu0 %v5178_v0 }
  0xaf   : > { %3562 = vmatmul.mubr.msk.f32.vlgmr.msra.gmra.mrb[0].mxu0 %vm355_vm4, %v3558_v6 }
  0xb0   : > { %844 = vmatprep.mubr.f32.mxu0 %v5178_v0  ;;  %3567 = vmatpush1.msk.msra.mxu0 %vm362_vm2, %v870_v1  ;;  %v2468_v1 = vld [vmem:[%s5174_s5 + $0x18] sm:$0xff] }
  0xb1   : > { %3572 = vmatprep.subr.msk.mxu0 %vm362_vm2, %v984_v9 }
  0xb2   : > { %v1312_v45 = vpop.permute.xlu0 %1311  ;;  %v1317_v50 = vpop.permute.xlu1 %1316 }
  0xb3   : > { %3563 = vmatmul.mubr.msk.f32.gmra.mrb[2].mxu0 %vm355_vm4, %v3559_v18 }
  0xb4   : > { %951 = vmatprep.mubr.f32.mxu0 %v5178_v0 }
  0xb7   : > { %3568 = vmatmul.mubr.msk.f32.vlgmr.msra.gmra.mrb[0].mxu0 %vm355_vm4, %v3564_v24 }
  0xb8   : > { %957 = vmatprep.mubr.f32.mxu0 %v5178_v0  ;;  %3573 = vmatpush1.msk.msra.mxu0 %vm362_vm2, %v983_v23 }
  0xb9   : > { %3578 = vmatprep.subr.msk.mxu0 %vm362_vm2, %v1097_v25 }
  0xbb   : > { %3569 = vmatmul.mubr.msk.f32.gmra.mrb[2].mxu0 %vm355_vm4, %v3565_v27 }
  0xbc   : > { %1064 = vmatprep.mubr.f32.mxu0 %v5178_v0 }
  0xbf   : > { %3574 = vmatmul.mubr.msk.f32.vlgmr.msra.gmra.mrb[0].mxu0 %vm355_vm4, %v3570_v33 }
  0xc0   : > { %1070 = vmatprep.mubr.f32.mxu0 %v5178_v0  ;;  %3579 = vmatpush1.msk.msra.mxu0 %vm362_vm2, %v1096_v11 }
  0xc1   : > { %3586 = vmatprep.subr.msk.mxu0 %vm362_vm2, %v1210_v34 }
  0xc3   : > { %3575 = vmatmul.mubr.msk.f32.gmra.mrb[2].mxu0 %vm355_vm4, %v3571_v35  ;;  %v3590_v35 = vld [vmem:[%s5173_s4 + $0x20] sm:$0xff] }
  0xc4   : > { %1177 = vmatprep.mubr.f32.mxu0 %v5178_v0 }
  0xc7   : > { %3580 = vmatmul.mubr.msk.f32.vlgmr.msra.gmra.mrb[0].mxu0 %vm355_vm4, %v3576_v40 }
  0xc8   : > { %1183 = vmatprep.mubr.f32.mxu0 %v5178_v0  ;;  %3587 = vmatpush1.msk.msra.mxu0 %vm362_vm2, %v1209_v39 }
  0xcb   : > { %3581 = vmatmul.mubr.msk.f32.gmra.mrb[2].mxu0 %vm355_vm4, %v3577_v42 }
  0xcc   : > { %1290 = vmatprep.mubr.f32.mxu0 %v5178_v0 }
  0xcf   : > { %3588 = vmatmul.mubr.msk.f32.vlgmr.msra.gmra.mrb[0].mxu0 %vm355_vm4, %v3584_v43 }
  0xd0   : > { %1296 = vmatprep.mubr.f32.mxu0 %v5178_v0 }
  0xd3   : > { %3589 = vmatmul.mubr.msk.f32.gmra.mrb[2].mxu0 %vm355_vm4, %v3585_v44 }
  0xd4   : > { %2640 = vmatprep.mubr.f32.mxu0 %v5178_v0 }
 0x1a2   : > { %v1292_v46 = vpop.f32.mrb[0].mxu0 }
 0x1a3   : > { %v1319_v47 = vadd.f32 %v1312_v45, %v1292_v46  ;;  %v1294_v49 = vpop.f32.mrb[1].mxu0 }
 0x1a4   : > { %v1320_v52 = vadd.f32 %v1312_v45, %v1294_v49 }
 0x1a5   : > { %v4286_v51 = vmax.f32 %v1319_v47, 0.0  ;;  %v3591_v47 = vld [vmem:[%s5173_s4 + $0x28] sm:$0xff] }
 0x1a6   : > { %v1298_v53 = vpop.f32.mrb[2].mxu0  ;;  %v4290_v58 = vmax.f32 %v1320_v52, 0.0 }
 0x1a7   : > { %v1321_v54 = vadd.f32 %v1317_v50, %v1298_v53  ;;  %v1300_v55 = vpop.f32.mrb[3].mxu0  ;;  %1347 = vrot.lane.b32.xlu1 %v4286_v51, %s3931_s11 }
 0x1a8   : > { %v1322_v57 = vadd.f32 %v1317_v50, %v1300_v55  ;;  %v3592_v55 = vld [vmem:[%s5173_s4 + $0x30] sm:$0xff] }
 0x1a9   : > { %v4292_v59 = vmax.f32 %v1321_v54, 0.0 }
 0x1aa   : > { %v4294_v60 = vmax.f32 %v1322_v57, 0.0 }
 0x1ab   : > { %1349 = vrot.lane.b32.xlu0 %v4292_v59, %s3931_s11  ;;  %1351 = vrot.lane.b32.xlu1 %v4290_v58, %s3931_s11  ;;  %v3697_v61 = vpack.c.bf16 %v4292_v59, %v4286_v51 }
 0x1ac   : > { %v3695_v62 = vpack.c.bf16 %v4294_v60, %v4290_v58 }
 0x1af   : > { %1353 = vrot.lane.b32.xlu0 %v4294_v60, %s3931_s11  ;;  %1327 = vrot.lane.b32.xlu1 %v4286_v51, %s3932_s12 }
 0x1b3   : > { %1329 = vrot.lane.b32.xlu0 %v4292_v59, %s3932_s12  ;;  %1331 = vrot.lane.b32.xlu1 %v4290_v58, %s3932_s12 }
 0x1b7   : > { %1333 = vrot.lane.b32.xlu0 %v4294_v60, %s3932_s12  ;;  %1571 = vrot.lane.b32.xlu1 %v4286_v51, %s3933_s13 }
 0x1bb   : > { %1573 = vrot.lane.b32.xlu0 %v4292_v59, %s3933_s13  ;;  %1575 = vrot.lane.b32.xlu1 %v4290_v58, %s3933_s13 }
 0x1bf   : > { %1577 = vrot.lane.b32.xlu0 %v4294_v60, %s3933_s13  ;;  %1701 = vrot.lane.b32.xlu1 %v4286_v51, %s3934_s14 }
 0x1c3   : > { %1703 = vrot.lane.b32.xlu0 %v4292_v59, %s3934_s14  ;;  %1705 = vrot.lane.b32.xlu1 %v4290_v58, %s3934_s14 }
 0x1c7   : > { %1707 = vrot.lane.b32.xlu0 %v4294_v60, %s3934_s14  ;;  %1945 = vrot.lane.b32.xlu1 %v4286_v51, %s3935_s15 }
 0x1cb   : > { %1947 = vrot.lane.b32.xlu0 %v4292_v59, %s3935_s15  ;;  %1949 = vrot.lane.b32.xlu1 %v4290_v58, %s3935_s15 }
 0x1cf   : > { %1951 = vrot.lane.b32.xlu0 %v4294_v60, %s3935_s15  ;;  %2075 = vrot.lane.b32.xlu1 %v4286_v51, %s3936_s16 }
 0x1d3   : > { %2077 = vrot.lane.b32.xlu0 %v4292_v59, %s3936_s16  ;;  %2079 = vrot.lane.b32.xlu1 %v4290_v58, %s3936_s16 }
 0x1d7   : > { %2081 = vrot.lane.b32.xlu0 %v4294_v60, %s3936_s16  ;;  %2205 = vrot.lane.b32.xlu1 %v4286_v51, %s3937_s17 }
 0x1db   : > { %2207 = vrot.lane.b32.xlu0 %v4292_v59, %s3937_s17  ;;  %2209 = vrot.lane.b32.xlu1 %v4290_v58, %s3937_s17 }
 0x1df   : > { %2211 = vrot.lane.b32.xlu0 %v4294_v60, %s3937_s17  ;;  %2335 = vrot.lane.b32.xlu1 %v4286_v51, %s3938_s18 }
 0x1e3   : > { %2337 = vrot.lane.b32.xlu0 %v4292_v59, %s3938_s18  ;;  %2339 = vrot.lane.b32.xlu1 %v4290_v58, %s3938_s18  ;;  %v3605_v58 = vld [vmem:[%s5173_s4 + $0x58] sm:$0xff] }
 0x1e7   : > { %2341 = vrot.lane.b32.xlu0 %v4294_v60, %s3938_s18  ;;  %2471 = vperm.xlu1 %3918, %v2465_v63  }
 0x1eb   : > { %2476 = vperm.xlu0 %3917, %v2466_v3   ;;  %2481 = vperm.xlu1 %3918, %v2467_v5  }
 0x1ef   : > { %2486 = vperm.xlu0 %3917, %v2468_v1  }
 0x219   : > { %v1348_v6 = vpop.permute.xlu1 %1347 }
 0x21d   : > { %v1352_v9 = vpop.permute.xlu1 %1351  ;;  %v1350_v10 = vpop.permute.xlu0 %1349 }
 0x21e   : > { %v1357_v13 = vsel %vm339_vm0, %v1352_v9, %v1348_v6  ;;  %v1355_v14 = vsel %vm339_vm0, %v1348_v6, %v1352_v9  ;;  %v3593_v9 = vld [vmem:[%s5173_s4 + $0x38] sm:$0xff] }
 0x21f   : > { %v1360_v25 = vmul.f32 %v1355_v14, %v4069_v16  ;;  %v1359_v12 = vmul.f32 %v1357_v13, %v4072_v17 }
 0x221   : > { %v1328_v18 = vpop.permute.xlu1 %1327  ;;  %v1354_v7 = vpop.permute.xlu0 %1353 }
 0x222   : > { %v1356_v22 = vsel %vm339_vm0, %v1350_v10, %v1354_v7  ;;  %v1358_v23 = vsel %vm339_vm0, %v1354_v7, %v1350_v10 }
 0x223   : > { %v1361_v24 = vmul.f32 %v1358_v23, %v4072_v17  ;;  %v1362_v26 = vmul.f32 %v1356_v22, %v4069_v16 }
 0x225   : > { %v1332_v27 = vpop.permute.xlu1 %1331  ;;  %v1330_v30 = vpop.permute.xlu0 %1329  ;;  %v3679_v32 = vpack.c.bf16 %v1362_v26, %v1360_v25  ;;  %v3681_v11 = vpack.c.bf16 %v1361_v24, %v1359_v12  ;;  %v1343_v24 = vld [vmem:[%s5173_s4] sm:$0xff] }
 0x226   : > { %v1335_v33 = vsel %vm320_vm1, %v1328_v18, %v1332_v27  ;;  %v1337_v34 = vsel %vm320_vm1, %v1332_v27, %v1328_v18 }
 0x227   : > { %3680 = vmatprep.subr.bf16.mxu1 %v3679_v32  ;;  %v1339_v43 = vmul.f32 %v1337_v34, %v4076_v19  ;;  %v1340_v44 = vmul.f32 %v1335_v33, %v4066_v15  ;;  %v1344_v32 = vld [vmem:[%s5173_s4 + $0x8] sm:$0xff]  ;;  %v1345_v33 = vld [vmem:[%s5173_s4 + $0x10] sm:$0xff] }
 0x228   : > { %3682 = vmatpush1.bf16.msra.mxu1 %v3681_v11 }
 0x229   : > { %v1572_v37 = vpop.permute.xlu1 %1571  ;;  %v1334_v39 = vpop.permute.xlu0 %1333 }
 0x22a   : > { %v1336_v40 = vsel %vm320_vm1, %v1330_v30, %v1334_v39  ;;  %v1338_v42 = vsel %vm320_vm1, %v1334_v39, %v1330_v30 }
 0x22b   : > { %v1341_v45 = vmul.f32 %v1338_v42, %v4076_v19  ;;  %v1342_v46 = vmul.f32 %v1336_v40, %v4066_v15  ;;  %3594 = vmatmul.mubr.msk.f32.vlgmr.msra.gmra.mrb[0].mxu1 %vm1368_vm10, %v3590_v35  ;;  %v1346_v35 = vld [vmem:[%s5173_s4 + $0x18] sm:$0xff]  ;;  %v3602_v42 = vld [vmem:[%s5173_s4 + $0x40] sm:$0xff] }
 0x22c   : > { %1451 = vmatprep.mubr.f32.mxu1 %v5178_v0 }
 0x22d   : > { %v3685_v49 = vpack.c.bf16 %v1341_v45, %v1339_v43  ;;  %v1576_v50 = vpop.permute.xlu1 %1575  ;;  %v1574_v52 = vpop.permute.xlu0 %1573  ;;  %v3683_v53 = vpack.c.bf16 %v1342_v46, %v1340_v44  ;;  %v3603_v45 = vld [vmem:[%s5173_s4 + $0x48] sm:$0xff] }
 0x22e   : > { %v1579_v54 = vsel %vm539_vm3, %v1572_v37, %v1576_v50  ;;  %v1581_v10 = vsel %vm539_vm3, %v1576_v50, %v1572_v37 }
 0x22f   : > { %3595 = vmatmul.mubr.msk.f32.gmra.mrb[2].mxu1 %vm1368_vm10, %v3591_v47  ;;  %3684 = vmatprep.subr.bf16.mxu1 %v3683_v53  ;;  %v1584_v5 = vmul.f32 %v1579_v54, %v4091_v29  ;;  %v1583_v22 = vmul.f32 %v1581_v10, %v4112_v38  ;;  %v3604_v47 = vld [vmem:[%s5173_s4 + $0x50] sm:$0xff]  ;;  %v3610_v53 = vld [vmem:[%s5173_s4 + $0x60] sm:$0xff] }
 0x230   : > { %3686 = vmatpush1.bf16.msra.mxu1 %v3685_v49  ;;  %1457 = vmatprep.mubr.f32.mxu1 %v5178_v0 }
 0x231   : > { %v1702_v57 = vpop.permute.xlu1 %1701  ;;  %v1578_v63 = vpop.permute.xlu0 %1577 }
 0x232   : > { %v1580_v3 = vsel %vm539_vm3, %v1574_v52, %v1578_v63  ;;  %v1582_v1 = vsel %vm539_vm3, %v1578_v63, %v1574_v52  ;;  %v3611_v63 = vld [vmem:[%s5173_s4 + $0x68] sm:$0xff] }
 0x233   : > { %v1586_v6 = vmul.f32 %v1580_v3, %v4091_v29  ;;  %3596 = vmatmul.mubr.msk.f32.gmra.mrb[4].mxu1 %vm1368_vm10, %v3592_v55  ;;  %v1585_v7 = vmul.f32 %v1582_v1, %v4112_v38 }
 0x234   : > { %1463 = vmatprep.mubr.f32.mxu1 %v5178_v0 }
 0x235   : > { %v1706_v13 = vpop.permute.xlu1 %1705  ;;  %v1704_v14 = vpop.permute.xlu0 %1703  ;;  %v3687_v18 = vpack.c.bf16 %v1586_v6, %v1584_v5  ;;  %v3689_v26 = vpack.c.bf16 %v1585_v7, %v1583_v22  ;;  %v3612_v5 = vld [vmem:[%s5173_s4 + $0x70] sm:$0xff]  ;;  %v3613_v6 = vld [vmem:[%s5173_s4 + $0x78] sm:$0xff]  ;;  %v3618_v7 = vld [vmem:[%s5173_s4 + $0x80] sm:$0xff] }
 0x236   : > { %v1709_v23 = vsel %vm652_vm5, %v1702_v57, %v1706_v13  ;;  %v1711_v37 = vsel %vm652_vm5, %v1706_v13, %v1702_v57 }
 0x237   : > { %3597 = vmatmul.mubr.msk.f32.gmra.mrb[6].mxu1 %vm1368_vm10, %v3593_v9  ;;  %3688 = vmatprep.subr.bf16.mxu1 %v3687_v18  ;;  %v1714_v27 = vmul.f32 %v1709_v23, %v4118_v41  ;;  %v1713_v40 = vmul.f32 %v1711_v37, %v4136_v48 }
 0x238   : > { %1546 = vmatprep.mubr.f32.mxu1 %v5178_v0 }
 0x239   : > { %v1708_v25 = vpop.permute.xlu0 %1707  ;;  %v1946_v46 = vpop.permute.xlu1 %1945 }
 0x23a   : > { %v1710_v12 = vsel %vm652_vm5, %v1704_v14, %v1708_v25  ;;  %v1712_v34 = vsel %vm652_vm5, %v1708_v25, %v1704_v14 }
 0x23b   : > { %v1716_v30 = vmul.f32 %v1710_v12, %v4118_v41  ;;  %3598 = vmatmul.mubr.msk.f32.vlgmr.msra.gmra.mrb[0].mxu1 %vm1368_vm10, %v1343_v24  ;;  %v1715_v39 = vmul.f32 %v1712_v34, %v4136_v48  ;;  %v3621_v34 = vld [vmem:[%s5173_s4 + $0x98] sm:$0xff] }
 0x23c   : > { %3690 = vmatpush1.bf16.msra.mxu1 %v3689_v26  ;;  %1552 = vmatprep.mubr.f32.mxu1 %v5178_v0  ;;  %v3619_v26 = vld [vmem:[%s5173_s4 + $0x88] sm:$0xff] }
 0x23d   : > { %v3691_v11 = vpack.c.bf16 %v1716_v30, %v1714_v27  ;;  %v3693_v43 = vpack.c.bf16 %v1715_v39, %v1713_v40  ;;  %v1948_v44 = vpop.permute.xlu0 %1947  ;;  %v1950_v50 = vpop.permute.xlu1 %1949  ;;  %v3620_v27 = vld [vmem:[%s5173_s4 + $0x90] sm:$0xff] }
 0x23e   : > { %v1955_v60 = vsel %vm859_vm6, %v1950_v50, %v1946_v46  ;;  %v1953_v9 = vsel %vm859_vm6, %v1946_v46, %v1950_v50 }
 0x23f   : > { %3599 = vmatmul.mubr.msk.f32.gmra.mrb[2].mxu1 %vm1368_vm10, %v1344_v32  ;;  %3692 = vmatprep.subr.bf16.mxu1 %v3691_v11  ;;  %v1958_v54 = vmul.f32 %v1955_v60, %v4158_v56  ;;  %v1957_v18 = vmul.f32 %v1953_v9, %v4178_v2 }
 0x240   : > { %1558 = vmatprep.mubr.f32.mxu1 %v5178_v0 }
 0x241   : > { %v1952_v49 = vpop.permute.xlu0 %1951  ;;  %v2076_v3 = vpop.permute.xlu1 %2075 }
 0x242   : > { %v1956_v52 = vsel %vm859_vm6, %v1952_v49, %v1948_v44  ;;  %v1954_v51 = vsel %vm859_vm6, %v1948_v44, %v1952_v49  ;;  %v3627_v49 = vld [vmem:[%s5173_s4 + $0xa8] sm:$0xff] }
 0x243   : > { %3600 = vmatmul.mubr.msk.f32.gmra.mrb[4].mxu1 %vm1368_vm10, %v1345_v33  ;;  %v1959_v10 = vmul.f32 %v1954_v51, %v4178_v2 }
 0x244   : > { %1564 = vmatprep.mubr.f32.mxu1 %v5178_v0 }
 0x245   : > { %v2078_v55 = vpop.permute.xlu0 %2077  ;;  %v2080_v59 = vpop.permute.xlu1 %2079  ;;  %v3701_v23 = vpack.c.bf16 %v1959_v10, %v1957_v18  ;;  %v3637_v10 = vld [vmem:[%s5173_s4 + $0xd8] sm:$0xff] }
 0x246   : > { %v2085_v13 = vsel %vm972_vm7, %v2080_v59, %v2076_v3 }
 0x247   : > { %3601 = vmatmul.mubr.msk.f32.gmra.mrb[6].mxu1 %vm1368_vm10, %v1346_v35  ;;  %v2088_v22 = vmul.f32 %v2085_v13, %v4184_v4  ;;  %v2083_v35 = vsel %vm972_vm7, %v2076_v3, %v2080_v59 }
 0x248   : > { %1668 = vmatprep.mubr.f32.mxu1 %v5178_v0 }
 0x249   : > { %v2082_v1 = vpop.permute.xlu0 %2081  ;;  %v2206_v12 = vpop.permute.xlu1 %2205 }
 0x24a   : > { %v2084_v32 = vsel %vm972_vm7, %v2078_v55, %v2082_v1 }
 0x24b   : > { %3606 = vmatmul.mubr.msk.f32.vlgmr.msra.gmra.mrb[0].mxu1 %vm1368_vm10, %v3602_v42  ;;  %v2089_v37 = vmul.f32 %v2084_v32, %v4204_v20  ;;  %v2087_v42 = vmul.f32 %v2083_v35, %v4204_v20 }
 0x24c   : > { %3694 = vmatpush1.bf16.msra.mxu1 %v3693_v43  ;;  %1674 = vmatprep.mubr.f32.mxu1 %v5178_v0  ;;  %v3626_v43 = vld [vmem:[%s5173_s4 + $0xa0] sm:$0xff] }
 0x24d   : > { %3696 = vmatprep.subr.bf16.mxu1 %v3695_v62  ;;  %v1960_v62 = vmul.f32 %v1956_v52, %v4158_v56  ;;  %v2208_v24 = vpop.permute.xlu0 %2207  ;;  %v2210_v11 = vpop.permute.xlu1 %2209  ;;  %v3628_v52 = vld [vmem:[%s5173_s4 + $0xb0] sm:$0xff] }
 0x24e   : > { %v2215_v39 = vsel %vm1085_vm8, %v2210_v11, %v2206_v12 }
 0x24f   : > { %3607 = vmatmul.mubr.msk.f32.gmra.mrb[2].mxu1 %vm1368_vm10, %v3603_v45  ;;  %v3699_v57 = vpack.c.bf16 %v1960_v62, %v1958_v54  ;;  %v2218_v44 = vmul.f32 %v2215_v39, %v4210_v21  ;;  %v3705_v45 = vpack.c.bf16 %v2089_v37, %v2087_v42  ;;  %v3629_v54 = vld [vmem:[%s5173_s4 + $0xb8] sm:$0xff] }
 0x250   : > { %1680 = vmatprep.mubr.f32.mxu1 %v5178_v0 }
 0x251   : > { %v2212_v30 = vpop.permute.xlu0 %2211  ;;  %v2336_v50 = vpop.permute.xlu1 %2335 }
 0x252   : > { %v2216_v33 = vsel %vm1085_vm8, %v2212_v30, %v2208_v24  ;;  %v2214_v60 = vsel %vm1085_vm8, %v2208_v24, %v2212_v30  ;;  %v3645_v24 = vld [vmem:[%s5173_s4 + $0xf8] sm:$0xff] }
 0x253   : > { %3608 = vmatmul.mubr.msk.f32.gmra.mrb[4].mxu1 %vm1368_vm10, %v3604_v47  ;;  %v2220_v40 = vmul.f32 %v2216_v33, %v4210_v21 }
 0x254   : > { %1686 = vmatprep.mubr.f32.mxu1 %v5178_v0 }
 0x255   : > { %v2338_v46 = vpop.permute.xlu0 %2337  ;;  %v3707_v47 = vpack.c.bf16 %v2220_v40, %v2218_v44  ;;  %v2340_v62 = vpop.permute.xlu1 %2339 }
 0x256   : > { %v2343_v13 = vsel %vm1198_vm9, %v2336_v50, %v2340_v62 }
 0x257   : > { %3609 = vmatmul.mubr.msk.f32.gmra.mrb[6].mxu1 %vm1368_vm10, %v3605_v58  ;;  %v2347_v18 = vmul.f32 %v4257_v36, %v2343_v13 }
 0x258   : > { %1798 = vmatprep.mubr.f32.mxu1 %v5178_v0 }
 0x259   : > { %v2342_v58 = vpop.permute.xlu0 %2341 }
 0x25a   : > { %v2344_v9 = vsel %vm1198_vm9, %v2338_v46, %v2342_v58 }
 0x25b   : > { %3614 = vmatmul.mubr.msk.f32.vlgmr.msra.gmra.mrb[0].mxu1 %vm1368_vm10, %v3610_v53  ;;  %v2346_v53 = vsel %vm1198_vm9, %v2342_v58, %v2338_v46 }
 0x25c   : > { %3698 = vmatpush1.bf16.msra.mxu1 %v3697_v61  ;;  %1804 = vmatprep.mubr.f32.mxu1 %v5178_v0  ;;  %v2086_v61 = vsel %vm972_vm7, %v2082_v1, %v2078_v55  ;;  %v2213_v55 = vsel %vm1085_vm8, %v2206_v12, %v2210_v11  ;;  %v2350_v3 = vmul.f32 %v4237_v31, %v2346_v53  ;;  %v3634_v1 = vld [vmem:[%s5173_s4 + $0xc0] sm:$0xff]  ;;  %v3652_v12 = vld [vmem:[%s5173_s4 + $0x110] sm:$0xff] }
 0x25d   : > { %3700 = vmatprep.subr.bf16.mxu1 %v3699_v57  ;;  %v2090_v14 = vmul.f32 %v2086_v61, %v4184_v4  ;;  %v2219_v57 = vmul.f32 %v2214_v60, %v4229_v28 }
 0x25f   : > { %3615 = vmatmul.mubr.msk.f32.gmra.mrb[2].mxu1 %vm1368_vm10, %v3611_v63  ;;  %v3703_v25 = vpack.c.bf16 %v2090_v14, %v2088_v22  ;;  %v2345_v63 = vsel %vm1198_vm9, %v2340_v62, %v2336_v50  ;;  %v2349_v14 = vmul.f32 %v4257_v36, %v2344_v9  ;;  %v3644_v36 = vld [vmem:[%s5173_s4 + $0xf0] sm:$0xff] }
 0x260   : > { %1810 = vmatprep.mubr.f32.mxu1 %v5178_v0  ;;  %v2348_v51 = vmul.f32 %v4237_v31, %v2345_v63  ;;  %v3636_v31 = vld [vmem:[%s5173_s4 + $0xd0] sm:$0xff] }
 0x261   : > { %v3713_v22 = vpack.c.bf16 %v2349_v14, %v2347_v18 }
 0x262   : > { %v3711_v61 = vpack.c.bf16 %v2350_v3, %v2348_v51 }
 0x263   : > { %3616 = vmatmul.mubr.msk.f32.gmra.mrb[4].mxu1 %vm1368_vm10, %v3612_v5  ;;  %v2217_v5 = vmul.f32 %v2213_v55, %v4229_v28 }
 0x264   : > { %1816 = vmatprep.mubr.f32.mxu1 %v5178_v0 }
 0x265   : > { %v3709_v59 = vpack.c.bf16 %v2219_v57, %v2217_v5 }
 0x266   : > { %v2472_v30 = vpop.permute.xlu1 %2471 }
 0x267   : > { %3617 = vmatmul.mubr.msk.f32.gmra.mrb[6].mxu1 %vm1368_vm10, %v3613_v6  ;;  %v3635_v6 = vld [vmem:[%s5173_s4 + $0xc8] sm:$0xff] }
 0x268   : > { %1912 = vmatprep.mubr.f32.mxu1 %v5178_v0 }
 0x26a   : > { %v2477_v35 = vpop.permute.xlu0 %2476  ;;  %v2482_v58 = vpop.permute.xlu1 %2481 }
 0x26b   : > { %3622 = vmatmul.mubr.msk.f32.vlgmr.msra.gmra.mrb[0].mxu1 %vm1368_vm10, %v3618_v7  ;;  %v3642_v7 = vld [vmem:[%s5173_s4 + $0xe0] sm:$0xff] }
 0x26c   : > { %3702 = vmatpush1.bf16.msra.mxu1 %v3701_v23  ;;  %1918 = vmatprep.mubr.f32.mxu1 %v5178_v0  ;;  %v3643_v23 = vld [vmem:[%s5173_s4 + $0xe8] sm:$0xff] }
 0x26d   : > { %3704 = vmatprep.subr.bf16.mxu1 %v3703_v25  ;;  %v3650_v25 = vld [vmem:[%s5173_s4 + $0x100] sm:$0xff] }
 0x26e   : > { %v2487_v62 = vpop.permute.xlu0 %2486 }
 0x26f   : > { %3623 = vmatmul.mubr.msk.f32.gmra.mrb[2].mxu1 %vm1368_vm10, %v3619_v26  ;;  %v3651_v26 = vld [vmem:[%s5173_s4 + $0x108] sm:$0xff] }
 0x270   : > { %1924 = vmatprep.mubr.f32.mxu1 %v5178_v0 }
 0x273   : > { %3624 = vmatmul.mubr.msk.f32.gmra.mrb[4].mxu1 %vm1368_vm10, %v3620_v27  ;;  %v3653_v27 = vld [vmem:[%s5173_s4 + $0x118] sm:$0xff] }
 0x274   : > { %1930 = vmatprep.mubr.f32.mxu1 %v5178_v0 }
 0x277   : > { %3625 = vmatmul.mubr.msk.f32.gmra.mrb[6].mxu1 %vm1368_vm10, %v3621_v34 }
 0x278   : > { %2042 = vmatprep.mubr.f32.mxu1 %v5178_v0 }
 0x27b   : > { %3630 = vmatmul.mubr.msk.f32.vlgmr.msra.gmra.mrb[0].mxu1 %vm1368_vm10, %v3626_v43 }
 0x27c   : > { %3706 = vmatpush1.bf16.msra.mxu1 %v3705_v45  ;;  %2048 = vmatprep.mubr.f32.mxu1 %v5178_v0 }
 0x27d   : > { %3708 = vmatprep.subr.bf16.mxu1 %v3707_v47 }
 0x27f   : > { %3631 = vmatmul.mubr.msk.f32.gmra.mrb[2].mxu1 %vm1368_vm10, %v3627_v49 }
 0x280   : > { %2054 = vmatprep.mubr.f32.mxu1 %v5178_v0 }
 0x283   : > { %3632 = vmatmul.mubr.msk.f32.gmra.mrb[4].mxu1 %vm1368_vm10, %v3628_v52 }
 0x284   : > { %2060 = vmatprep.mubr.f32.mxu1 %v5178_v0 }
 0x287   : > { %3633 = vmatmul.mubr.msk.f32.gmra.mrb[6].mxu1 %vm1368_vm10, %v3629_v54 }
 0x288   : > { %2172 = vmatprep.mubr.f32.mxu1 %v5178_v0 }
 0x28b   : > { %3638 = vmatmul.mubr.msk.f32.vlgmr.msra.gmra.mrb[0].mxu1 %vm1368_vm10, %v3634_v1 }
 0x28c   : > { %3710 = vmatpush1.bf16.msra.mxu1 %v3709_v59  ;;  %2178 = vmatprep.mubr.f32.mxu1 %v5178_v0 }
 0x28d   : > { %3712 = vmatprep.subr.bf16.mxu1 %v3711_v61 }
 0x28f   : > { %3639 = vmatmul.mubr.msk.f32.gmra.mrb[2].mxu1 %vm1368_vm10, %v3635_v6 }
 0x290   : > { %2184 = vmatprep.mubr.f32.mxu1 %v5178_v0 }
 0x293   : > { %3640 = vmatmul.mubr.msk.f32.gmra.mrb[4].mxu1 %vm1368_vm10, %v3636_v31  ;;  %v3459_v31 = vld [vmem:[%s5176_s7] sm:$0x7] }
 0x294   : > { %2190 = vmatprep.mubr.f32.mxu1 %v5178_v0 }
 0x297   : > { %3641 = vmatmul.mubr.msk.f32.gmra.mrb[6].mxu1 %vm1368_vm10, %v3637_v10 }
 0x298   : > { %2302 = vmatprep.mubr.f32.mxu1 %v5178_v0 }
 0x29b   : > { %3646 = vmatmul.mubr.msk.f32.vlgmr.msra.gmra.mrb[0].mxu1 %vm1368_vm10, %v3642_v7 }
 0x29c   : > { %3714 = vmatpush1.bf16.msra.mxu1 %v3713_v22  ;;  %2308 = vmatprep.mubr.f32.mxu1 %v5178_v0 }
 0x29f   : > { %3647 = vmatmul.mubr.msk.f32.gmra.mrb[2].mxu1 %vm1368_vm10, %v3643_v23 }
 0x2a0   : > { %2314 = vmatprep.mubr.f32.mxu1 %v5178_v0 }
 0x2a3   : > { %3648 = vmatmul.mubr.msk.f32.gmra.mrb[4].mxu1 %vm1368_vm10, %v3644_v36 }
 0x2a4   : > { %2320 = vmatprep.mubr.f32.mxu1 %v5178_v0 }
 0x2a7   : > { %3649 = vmatmul.mubr.msk.f32.gmra.mrb[6].mxu1 %vm1368_vm10, %v3645_v24 }
 0x2a8   : > { %2432 = vmatprep.mubr.f32.mxu1 %v5178_v0 }
 0x2ab   : > { %3654 = vmatmul.mubr.msk.f32.vlgmr.msra.gmra.mrb[0].mxu1 %vm1368_vm10, %v3650_v25 }
 0x2ac   : > { %2438 = vmatprep.mubr.f32.mxu1 %v5178_v0 }
 0x2af   : > { %3655 = vmatmul.mubr.msk.f32.gmra.mrb[2].mxu1 %vm1368_vm10, %v3651_v26 }
 0x2b0   : > { %2444 = vmatprep.mubr.f32.mxu1 %v5178_v0 }
 0x2b3   : > { %3656 = vmatmul.mubr.msk.f32.gmra.mrb[4].mxu1 %vm1368_vm10, %v3652_v12 }
 0x2b4   : > { %2450 = vmatprep.mubr.f32.mxu1 %v5178_v0 }
 0x2b7   : > { %3657 = vmatmul.mubr.msk.f32.gmra.mrb[6].mxu1 %vm1368_vm10, %v3653_v27 }
 0x37e   : > { %v2434_v32 = vpop.f32.mrb[0].mxu1 }
 0x37f   : > { %v2489_v11 = vadd.f32 %v2472_v30, %v2434_v32  ;;  %v2436_v33 = vpop.f32.mrb[1].mxu1 }
 0x380   : > { %v2490_v47 = vadd.f32 %v2472_v30, %v2436_v33 }
 0x381   : > { %v4655_v34 = vmax.f32 %v2489_v11, 0.0 }
 0x382   : > { %v2440_v37 = vpop.f32.mrb[2].mxu1  ;;  %v4677_v49 = vmax.f32 %v2490_v47, 0.0 }
 0x383   : > { %v2491_v39 = vadd.f32 %v2477_v35, %v2440_v37  ;;  %2538 = vrot.lane.b32.xlu1 %v4655_v34, %s3931_s11  ;;  %v2442_v40 = vpop.f32.mrb[3].mxu1 }
 0x384   : > { %v2492_v50 = vadd.f32 %v2477_v35, %v2442_v40 }
 0x385   : > { %v4659_v42 = vmax.f32 %v2491_v39, 0.0 }
 0x386   : > { %v2446_v43 = vpop.f32.mrb[4].mxu1  ;;  %v4683_v52 = vmax.f32 %v2492_v50, 0.0 }
 0x387   : > { %2505 = vrot.lane.b32.xlu1 %v4655_v34, %s3932_s12  ;;  %v2448_v44 = vpop.f32.mrb[5].mxu1  ;;  %2540 = vrot.lane.b32.xlu0 %v4659_v42, %s3931_s11  ;;  %v2493_v60 = vadd.f32 %v2482_v58, %v2446_v43 }
 0x388   : > { %v2494_v57 = vadd.f32 %v2482_v58, %v2448_v44 }
 0x389   : > { %v4701_v53 = vmax.f32 %v2493_v60, 0.0 }
 0x38a   : > { %v2452_v45 = vpop.f32.mrb[6].mxu1  ;;  %v4725_v63 = vmax.f32 %v2494_v57, 0.0 }
 0x38b   : > { %2721 = vrot.lane.b32.xlu1 %v4655_v34, %s3933_s13  ;;  %v2454_v46 = vpop.f32.mrb[7].mxu1  ;;  %2507 = vrot.lane.b32.xlu0 %v4659_v42, %s3932_s12  ;;  %v2495_v54 = vadd.f32 %v2487_v62, %v2452_v45 }
 0x38c   : > { %v2496_v3 = vadd.f32 %v2487_v62, %v2454_v46 }
 0x38d   : > { %v4707_v55 = vmax.f32 %v2495_v54, 0.0 }
 0x38e   : > { %v4731_v5 = vmax.f32 %v2496_v3, 0.0 }
 0x38f   : > { %2831 = vrot.lane.b32.xlu1 %v4655_v34, %s3934_s14  ;;  %2723 = vrot.lane.b32.xlu0 %v4659_v42, %s3933_s13 }
 0x393   : > { %3019 = vrot.lane.b32.xlu1 %v4655_v34, %s3935_s15  ;;  %2833 = vrot.lane.b32.xlu0 %v4659_v42, %s3934_s14 }
 0x397   : > { %2546 = vrot.lane.b32.xlu1 %v4677_v49, %s3931_s11  ;;  %3021 = vrot.lane.b32.xlu0 %v4659_v42, %s3935_s15 }
 0x39b   : > { %2513 = vrot.lane.b32.xlu1 %v4677_v49, %s3932_s12  ;;  %2548 = vrot.lane.b32.xlu0 %v4683_v52, %s3931_s11 }
 0x39f   : > { %2729 = vrot.lane.b32.xlu1 %v4677_v49, %s3933_s13  ;;  %2515 = vrot.lane.b32.xlu0 %v4683_v52, %s3932_s12 }
 0x3a3   : > { %2839 = vrot.lane.b32.xlu1 %v4677_v49, %s3934_s14  ;;  %2731 = vrot.lane.b32.xlu0 %v4683_v52, %s3933_s13 }
 0x3a7   : > { %3027 = vrot.lane.b32.xlu1 %v4677_v49, %s3935_s15  ;;  %2841 = vrot.lane.b32.xlu0 %v4683_v52, %s3934_s14 }
 0x3ab   : > { %2542 = vrot.lane.b32.xlu1 %v4701_v53, %s3931_s11  ;;  %3029 = vrot.lane.b32.xlu0 %v4683_v52, %s3935_s15 }
 0x3af   : > { %2509 = vrot.lane.b32.xlu1 %v4701_v53, %s3932_s12  ;;  %2544 = vrot.lane.b32.xlu0 %v4707_v55, %s3931_s11 }
 0x3b3   : > { %2725 = vrot.lane.b32.xlu1 %v4701_v53, %s3933_s13  ;;  %2511 = vrot.lane.b32.xlu0 %v4707_v55, %s3932_s12 }
 0x3b7   : > { %2835 = vrot.lane.b32.xlu1 %v4701_v53, %s3934_s14  ;;  %2727 = vrot.lane.b32.xlu0 %v4707_v55, %s3933_s13 }
 0x3bb   : > { %3023 = vrot.lane.b32.xlu1 %v4701_v53, %s3935_s15  ;;  %2837 = vrot.lane.b32.xlu0 %v4707_v55, %s3934_s14 }
 0x3bf   : > { %2550 = vrot.lane.b32.xlu1 %v4725_v63, %s3931_s11  ;;  %3025 = vrot.lane.b32.xlu0 %v4707_v55, %s3935_s15 }
 0x3c3   : > { %3129 = vrot.lane.b32.xlu1 %v4655_v34, %s3936_s16  ;;  %2552 = vrot.lane.b32.xlu0 %v4731_v5, %s3931_s11 }
 0x3c7   : > { %2517 = vrot.lane.b32.xlu1 %v4725_v63, %s3932_s12  ;;  %3131 = vrot.lane.b32.xlu0 %v4659_v42, %s3936_s16 }
 0x3cb   : > { %2733 = vrot.lane.b32.xlu1 %v4725_v63, %s3933_s13  ;;  %2519 = vrot.lane.b32.xlu0 %v4731_v5, %s3932_s12 }
 0x3cf   : > { %2843 = vrot.lane.b32.xlu1 %v4725_v63, %s3934_s14  ;;  %3139 = vrot.lane.b32.xlu0 %v4683_v52, %s3936_s16 }
 0x3d3   : > { %3031 = vrot.lane.b32.xlu1 %v4725_v63, %s3935_s15  ;;  %2735 = vrot.lane.b32.xlu0 %v4731_v5, %s3933_s13 }
 0x3d7   : > { %3137 = vrot.lane.b32.xlu1 %v4677_v49, %s3936_s16  ;;  %3135 = vrot.lane.b32.xlu0 %v4707_v55, %s3936_s16 }
 0x3db   : > { %3133 = vrot.lane.b32.xlu1 %v4701_v53, %s3936_s16  ;;  %2845 = vrot.lane.b32.xlu0 %v4731_v5, %s3934_s14 }
 0x3df   : > { %3141 = vrot.lane.b32.xlu1 %v4725_v63, %s3936_s16  ;;  %3241 = vrot.lane.b32.xlu0 %v4659_v42, %s3937_s17 }
 0x3e3   : > { %3239 = vrot.lane.b32.xlu1 %v4655_v34, %s3937_s17  ;;  %3249 = vrot.lane.b32.xlu0 %v4683_v52, %s3937_s17 }
 0x3e7   : > { %3247 = vrot.lane.b32.xlu1 %v4677_v49, %s3937_s17  ;;  %3245 = vrot.lane.b32.xlu0 %v4707_v55, %s3937_s17 }
 0x3eb   : > { %3243 = vrot.lane.b32.xlu1 %v4701_v53, %s3937_s17  ;;  %3033 = vrot.lane.b32.xlu0 %v4731_v5, %s3935_s15 }
 0x3ef   : > { %3251 = vrot.lane.b32.xlu1 %v4725_v63, %s3937_s17  ;;  %3351 = vrot.lane.b32.xlu0 %v4659_v42, %s3938_s18 }
 0x3f3   : > { %3349 = vrot.lane.b32.xlu1 %v4655_v34, %s3938_s18  ;;  %3143 = vrot.lane.b32.xlu0 %v4731_v5, %s3936_s16 }
 0x3f5   : > { %v2539_v1 = vpop.permute.xlu1 %2538 }
 0x3f7   : > { %3357 = vrot.lane.b32.xlu1 %v4677_v49, %s3938_s18  ;;  %3359 = vrot.lane.b32.xlu0 %v4683_v52, %s3938_s18 }
 0x3f9   : > { %v4789_v51 = vpop.permute.xlu1 %2505  ;;  %v2541_v59 = vpop.permute.xlu0 %2540 }
 0x3fb   : > { %3353 = vrot.lane.b32.xlu1 %v4701_v53, %s3938_s18  ;;  %3253 = vrot.lane.b32.xlu0 %v4731_v5, %s3937_s17 }
 0x3fd   : > { %v4795_v61 = vpop.permute.xlu1 %2721  ;;  %v4797_v6 = vpop.permute.xlu0 %2507 }
 0x3ff   : > { %3361 = vrot.lane.b32.xlu1 %v4725_v63, %s3938_s18  ;;  %3355 = vrot.lane.b32.xlu0 %v4707_v55, %s3938_s18 }
 0x401   : > { %v2832_v9 = vpop.permute.xlu1 %2831  ;;  %v4806_v10 = vpop.permute.xlu0 %2723 }
 0x403   : > { %3462 = vperm.xlu1 %3918, %v3459_v31   ;;  %3363 = vrot.lane.b32.xlu0 %v4731_v5, %s3938_s18  ;;  %s305_s18 = scalar_lea.vmem %s5177_s8, %s3677_s29 }
 0x405   : > { %v3020_v13 = vpop.permute.xlu1 %3019  ;;  %v2834_v14 = vpop.permute.xlu0 %2833 }
 0x409   : > { %v2547_v18 = vpop.permute.xlu1 %2546  ;;  %v3022_v7 = vpop.permute.xlu0 %3021 }
 0x40a   : > { %v2554_v22 = vsel %vm339_vm0, %v2539_v1, %v2547_v18  ;;  %v2558_v23 = vsel %vm339_vm0, %v2547_v18, %v2539_v1 }
 0x40b   : > { %v2562_v12 = vmul.f32 %v2558_v23, %v4072_v17  ;;  %v2563_v27 = vmul.f32 %v2554_v22, %v4069_v16 }
 0x40d   : > { %v4814_v36 = vpop.permute.xlu1 %2513  ;;  %v2549_v24 = vpop.permute.xlu0 %2548 }
 0x40e   : > { %v2555_v25 = vsel %vm339_vm0, %v2541_v59, %v2549_v24  ;;  %v2559_v26 = vsel %vm339_vm0, %v2549_v24, %v2541_v59 }
 0x40f   : > { %v2564_v30 = vmul.f32 %v2559_v26, %v4072_v17  ;;  %v2565_v32 = vmul.f32 %v2555_v25, %v4069_v16 }
 0x411   : > { %v3717_v11 = vpack.c.bf16 %v2564_v30, %v2562_v12  ;;  %v4824_v33 = vpop.permute.xlu1 %2729  ;;  %v2516_v35 = vpop.permute.xlu0 %2515  ;;  %v3715_v37 = vpack.c.bf16 %v2565_v32, %v2563_v27 }
 0x412   : > { %v2741_v39 = vsel %vm539_vm3, %v4824_v33, %v4795_v61  ;;  %v2526_v32 = vsel %vm320_vm1, %v2516_v35, %v4797_v6 }
 0x413   : > { %3716 = vmatprep.subr.bf16.mxu0 %v3715_v37  ;;  %v4834_v45 = vmul.f32 %v2741_v39, %v4112_v38 }
 0x414   : > { %3718 = vmatpush1.bf16.msra.mxu0 %v3717_v11 }
 0x415   : > { %v2840_v40 = vpop.permute.xlu1 %2839  ;;  %v2732_v43 = vpop.permute.xlu0 %2731 }
 0x416   : > { %v2742_v44 = vsel %vm539_vm3, %v2732_v43, %v4806_v10  ;;  %v2847_v47 = vsel %vm652_vm5, %v2832_v9, %v2840_v40  ;;  %v2851_v50 = vsel %vm652_vm5, %v2840_v40, %v2832_v9 }
 0x417   : > { %v4837_v46 = vmul.f32 %v2742_v44, %v4112_v38  ;;  %v4850_v3 = vmul.f32 %v2851_v50, %v4136_v48  ;;  %v4853_v1 = vmul.f32 %v2847_v47, %v4118_v41 }
 0x419   : > { %v3028_v60 = vpop.permute.xlu1 %3027  ;;  %v2842_v62 = vpop.permute.xlu0 %2841 }
 0x41a   : > { %v2848_v54 = vsel %vm652_vm5, %v2834_v14, %v2842_v62  ;;  %v2852_v57 = vsel %vm652_vm5, %v2842_v62, %v2834_v14  ;;  %v3035_v9 = vsel %vm859_vm6, %v3020_v13, %v3028_v60  ;;  %v3039_v18 = vsel %vm859_vm6, %v3028_v60, %v3020_v13 }
 0x41b   : > { %v4856_v59 = vmul.f32 %v2852_v57, %v4136_v48  ;;  %v4859_v31 = vmul.f32 %v2848_v54, %v4118_v41  ;;  %v4874_v12 = vmul.f32 %v3035_v9, %v4178_v2  ;;  %v4877_v27 = vmul.f32 %v3039_v18, %v4158_v56 }
 0x41c   : > { %v2522_v57 = vsel %vm320_vm1, %v4797_v6, %v2516_v35  ;;  %v2525_v6 = vsel %vm320_vm1, %v4814_v36, %v4789_v51 }
 0x41d   : > { %v2543_v22 = vpop.permute.xlu1 %2542  ;;  %v3030_v23 = vpop.permute.xlu0 %3029 }
 0x41e   : > { %v3036_v25 = vsel %vm859_vm6, %v3022_v7, %v3030_v23  ;;  %v3040_v26 = vsel %vm859_vm6, %v3030_v23, %v3022_v7  ;;  %v2521_v23 = vsel %vm320_vm1, %v4789_v51, %v4814_v36  ;;  %v2532_v7 = vmul.f32 %v2522_v57, %v4066_v15 }
 0x41f   : > { %v4880_v13 = vmul.f32 %v3036_v25, %v4178_v2  ;;  %v4883_v30 = vmul.f32 %v3040_v26, %v4158_v56  ;;  %v2530_v35 = vmul.f32 %v2521_v23, %v4066_v15 }
 0x421   : > { %v2510_v11 = vpop.permute.xlu1 %2509  ;;  %v2545_v37 = vpop.permute.xlu0 %2544 }
 0x425   : > { %v2726_v39 = vpop.permute.xlu1 %2725  ;;  %v2512_v40 = vpop.permute.xlu0 %2511 }
 0x429   : > { %v4889_v44 = vpop.permute.xlu1 %2835  ;;  %v4891_v47 = vpop.permute.xlu0 %2727 }
 0x42d   : > { %v4893_v50 = vpop.permute.xlu1 %3023  ;;  %v4895_v60 = vpop.permute.xlu0 %2837 }
 0x431   : > { %v2551_v62 = vpop.permute.xlu1 %2550  ;;  %v4897_v54 = vpop.permute.xlu0 %3025 }
 0x432   : > { %v2556_v9 = vsel %vm339_vm0, %v2543_v22, %v2551_v62  ;;  %v2560_v18 = vsel %vm339_vm0, %v2551_v62, %v2543_v22 }
 0x433   : > { %v2566_v62 = vmul.f32 %v2560_v18, %v4072_v17  ;;  %v2567_v24 = vmul.f32 %v2556_v9, %v4069_v16  ;;  %v2531_v18 = vmul.f32 %v2526_v32, %v4076_v19 }
 0x435   : > { %v4910_v25 = vpop.permute.xlu1 %3129  ;;  %v2553_v26 = vpop.permute.xlu0 %2552 }
 0x436   : > { %v2557_v14 = vsel %vm339_vm0, %v2545_v37, %v2553_v26  ;;  %v2561_v22 = vsel %vm339_vm0, %v2553_v26, %v2545_v37 }
 0x437   : > { %v2568_v58 = vmul.f32 %v2561_v22, %v4072_v17  ;;  %v2569_v0 = vmul.f32 %v2557_v14, %v4069_v16  ;;  %v2738_v17 = vsel %vm539_vm3, %v4806_v10, %v2732_v43  ;;  %v3723_v16 = vpack.c.bf16 %v2532_v7, %v2530_v35 }
 0x438   : > { %v2529_v14 = vmul.f32 %v2525_v6, %v4076_v19  ;;  %v2737_v10 = vsel %vm539_vm3, %v4795_v61, %v4824_v33  ;;  %v2748_v32 = vmul.f32 %v2738_v17, %v4091_v29  ;;  %v5186_v33 = vmov 0.0  }
 0x439   : > { %v3721_v57 = vpack.c.bf16 %v2568_v58, %v2566_v62  ;;  %v2518_v28 = vpop.permute.xlu1 %2517  ;;  %v4929_v21 = vpop.permute.xlu0 %3131  ;;  %v3719_v37 = vpack.c.bf16 %v2569_v0, %v2567_v24  ;;  %v3658_v0 = vld [vmem:[%s5175_s6 + $0x4] sm:$0x7]  ;;  %v2746_v26 = vmul.f32 %v2737_v10, %v4091_v29 }
 0x43a   : > { %v2523_v51 = vsel %vm320_vm1, %v2510_v11, %v2518_v28  ;;  %v2527_v36 = vsel %vm320_vm1, %v2518_v28, %v2510_v11  ;;  %v3725_v24 = vpack.c.bf16 %v2531_v18, %v2529_v14 }
 0x43b   : > { %3720 = vmatprep.subr.bf16.mxu0 %v3719_v37  ;;  %v2533_v7 = vmul.f32 %v2527_v36, %v4076_v19  ;;  %v2534_v9 = vmul.f32 %v2523_v51, %v4066_v15  ;;  %v3731_v35 = vpack.c.bf16 %v2748_v32, %v2746_v26 }
 0x43c   : > { %3722 = vmatpush1.bf16.msra.mxu0 %v3721_v57 }
 0x43d   : > { %v2734_v43 = vpop.permute.xlu1 %2733  ;;  %3724 = vmatprep.subr.bf16.mxu0 %v3723_v16  ;;  %v2520_v58 = vpop.permute.xlu0 %2519 }
 0x43e   : > { %v2524_v28 = vsel %vm320_vm1, %v2512_v40, %v2520_v58  ;;  %v2528_v11 = vsel %vm320_vm1, %v2520_v58, %v2512_v40  ;;  %v2739_v57 = vsel %vm539_vm3, %v2726_v39, %v2734_v43 }
 0x43f   : > { %v2535_v23 = vmul.f32 %v2528_v11, %v4076_v19  ;;  %v2536_v61 = vmul.f32 %v2524_v28, %v4066_v15  ;;  %3659 = vmatmul.mubr.msk.f32.vlgmr.msra.gmra.mrb[4].mxu0 %vm2572_vm11, %v3658_v0  ;;  %v2743_v15 = vsel %vm539_vm3, %v2734_v43, %v2726_v39  ;;  %v2537_v19 = vld [vmem:[%s5175_s6] sm:$0x7]  ;;  %v2750_v39 = vmul.f32 %v2739_v57, %v4091_v29 }
 0x440   : > { %3726 = vmatpush1.bf16.msra.mxu0 %v3725_v24  ;;  %2714 = vmatprep.mubr.f32.mxu0 %v5186_v33  ;;  %v2749_v14 = vmul.f32 %v2743_v15, %v4112_v38  ;;  %v5187_v0 = vpack.c.bf16 %v4837_v46, %v4834_v45  ;;  %v3661_v45 = vld [vmem:[%s5175_s6 + $0x8] sm:$0x7]  ;;  %v5188_v24 = vpack.c.bf16 %v4859_v31, %v4853_v1 }
 0x441   : > { %v3729_v22 = vpack.c.bf16 %v2535_v23, %v2533_v7  ;;  %v2844_v62 = vpop.permute.xlu1 %2843  ;;  %v4959_v6 = vpop.permute.xlu0 %3139  ;;  %v3727_v40 = vpack.c.bf16 %v2536_v61, %v2534_v9  ;;  %v5189_v1 = vpack.c.bf16 %v4856_v59, %v4850_v3  ;;  %v3749_v59 = vpack.c.bf16 %v4659_v42, %v4655_v34 }
 0x443   : > { %3728 = vmatprep.subr.bf16.mxu0 %v3727_v40  ;;  %v3753_v40 = vpack.c.bf16 %v4707_v55, %v4701_v53  ;;  %v3150_v53 = vsel %vm972_vm7, %v4959_v6, %v4929_v21 }
 0x444   : > { %3730 = vmatpush1.bf16.msra.mxu0 %v3729_v22  ;;  %v3747_v22 = vpack.c.bf16 %v4683_v52, %v4677_v49 }
 0x445   : > { %v3032_v37 = vpop.permute.xlu1 %3031  ;;  %3732 = vmatprep.subr.bf16.mxu0 %v3731_v35  ;;  %v2736_v18 = vpop.permute.xlu0 %2735 }
 0x446   : > { %v2740_v17 = vsel %vm539_vm3, %v4891_v47, %v2736_v18  ;;  %v2744_v16 = vsel %vm539_vm3, %v2736_v18, %v4891_v47  ;;  %v3037_v35 = vsel %vm859_vm6, %v4893_v50, %v3032_v37  ;;  %v3041_v34 = vsel %vm859_vm6, %v3032_v37, %v4893_v50 }
 0x447   : > { %v2751_v51 = vmul.f32 %v2744_v16, %v4112_v38  ;;  %v2752_v36 = vmul.f32 %v2740_v17, %v4091_v29  ;;  %3660 = vmatmul.mubr.msk.f32.vlgmr.msra.gmra.mrb[4].mxu0 %vm2572_vm11, %v2537_v19  ;;  %v2849_v38 = vsel %vm652_vm5, %v4889_v44, %v2844_v62  ;;  %v2853_v29 = vsel %vm652_vm5, %v2844_v62, %v4889_v44 }
 0x448   : > { %3734 = vmatpush1.bf16.msra.mxu0 %v5187_v0  ;;  %2822 = vmatprep.mubr.f32.mxu0 %v5186_v33  ;;  %v2859_v11 = vmul.f32 %v2853_v29, %v4136_v48  ;;  %v2860_v7 = vmul.f32 %v2849_v38, %v4118_v41  ;;  %v3751_v62 = vpack.c.bf16 %v4731_v5, %v4725_v63  ;;  %v3665_v63 = vld [vmem:[%s5175_s6 + $0x10] sm:$0x7]  ;;  %v3667_v0 = vld [vmem:[%s5175_s6 + $0x14] sm:$0x7] }
 0x449   : > { %v3737_v10 = vpack.c.bf16 %v2751_v51, %v2749_v14  ;;  %v3138_v43 = vpop.permute.xlu1 %3137  ;;  %v4983_v58 = vpop.permute.xlu0 %3135  ;;  %v3735_v47 = vpack.c.bf16 %v2752_v36, %v2750_v39  ;;  %v5190_v5 = vpack.c.bf16 %v4883_v30, %v4877_v27  ;;  %v3047_v57 = vmul.f32 %v3037_v35, %v4178_v2 }
 0x44a   : > { %v3149_v42 = vsel %vm972_vm7, %v3138_v43, %v4910_v25  ;;  %v3145_v15 = vsel %vm972_vm7, %v4910_v25, %v3138_v43  ;;  %v3048_v18 = vmul.f32 %v3041_v34, %v4158_v56  ;;  %v3146_v25 = vsel %vm972_vm7, %v4929_v21, %v4959_v6 }
 0x44b   : > { %3736 = vmatprep.subr.bf16.mxu0 %v3735_v47  ;;  %v3154_v27 = vmul.f32 %v3149_v42, %v4184_v4  ;;  %v5191_v16 = vpack.c.bf16 %v4880_v13, %v4874_v12  ;;  %v3153_v14 = vmul.f32 %v3145_v15, %v4204_v20  ;;  %v3155_v21 = vmul.f32 %v3146_v25, %v4204_v20 }
 0x44c   : > { %3738 = vmatpush1.bf16.msra.mxu0 %v3737_v10 }
 0x44d   : > { %v4994_v46 = vpop.permute.xlu1 %3133  ;;  %3740 = vmatprep.subr.bf16.mxu0 %v5188_v24  ;;  %v2846_v32 = vpop.permute.xlu0 %2845  ;;  %v3765_v10 = vpack.c.bf16 %v3155_v21, %v3153_v14 }
 0x44e   : > { %v2850_v28 = vsel %vm652_vm5, %v4895_v60, %v2846_v32  ;;  %v2854_v44 = vsel %vm652_vm5, %v2846_v32, %v4895_v60 }
 0x44f   : > { %v2861_v9 = vmul.f32 %v2854_v44, %v4136_v48  ;;  %v2862_v23 = vmul.f32 %v2850_v28, %v4118_v41  ;;  %3662 = vmatmul.mubr.msk.f32.vlgmr.msra.gmra.mrb[4].mxu0 %vm2572_vm11, %v3661_v45  ;;  %v3663_v41 = vld [vmem:[%s5175_s6 + $0xc] sm:$0x7]  ;;  %v5192_v28 = vld [vmem:[#allocation2_spill] sm:$0xff] }
 0x450   : > { %3742 = vmatpush1.bf16.msra.mxu0 %v5189_v1  ;;  %2932 = vmatprep.mubr.f32.mxu0 %v5186_v33 }
 0x451   : > { %v3745_v31 = vpack.c.bf16 %v2861_v9, %v2859_v11  ;;  %v3142_v61 = vpop.permute.xlu1 %3141  ;;  %v5014_v26 = vpop.permute.xlu0 %3241  ;;  %v3743_v60 = vpack.c.bf16 %v2862_v23, %v2860_v7 }
 0x452   : > { %v3147_v36 = vsel %vm972_vm7, %v4994_v46, %v3142_v61  ;;  %v3151_v12 = vsel %vm972_vm7, %v3142_v61, %v4994_v46 }
 0x453   : > { %3744 = vmatprep.subr.bf16.mxu0 %v3743_v60  ;;  %v3157_v43 = vmul.f32 %v3147_v36, %v4204_v20  ;;  %v3158_v32 = vmul.f32 %v3151_v12, %v4184_v4 }
 0x454   : > { %3746 = vmatpush1.bf16.msra.mxu0 %v3745_v31 }
 0x455   : > { %v3240_v48 = vpop.permute.xlu1 %3239  ;;  %3748 = vmatprep.subr.bf16.mxu0 %v3747_v22  ;;  %v3250_v3 = vpop.permute.xlu0 %3249 }
 0x456   : > { %v3260_v29 = vsel %vm1085_vm8, %v3250_v3, %v5014_v26  ;;  %v3256_v9 = vsel %vm1085_vm8, %v5014_v26, %v3250_v3 }
 0x457   : > { %3664 = vmatmul.mubr.msk.f32.vlgmr.msra.gmra.mrb[4].mxu0 %vm2572_vm11, %v3663_v41  ;;  %v3266_v23 = vmul.f32 %v3260_v29, %v5192_v28 }
 0x458   : > { %3750 = vmatpush1.bf16.msra.mxu0 %v3749_v59  ;;  %3010 = vmatprep.mubr.f32.mxu0 %v5186_v33  ;;  %v3669_v59 = vld [vmem:[%s5175_s6 + $0x18] sm:$0x7] }
 0x459   : > { %v3248_v49 = vpop.permute.xlu1 %3247  ;;  %3752 = vmatprep.subr.bf16.mxu0 %v3751_v62  ;;  %v5027_v52 = vpop.permute.xlu0 %3245 }
 0x45a   : > { %v3259_v13 = vsel %vm1085_vm8, %v3248_v49, %v3240_v48  ;;  %v3255_v45 = vsel %vm1085_vm8, %v3240_v48, %v3248_v49 }
 0x45b   : > { %v3264_v44 = vmul.f32 %v3259_v13, %v5192_v28 }
 0x45c   : > { %3754 = vmatpush1.bf16.msra.mxu0 %v3753_v40 }
 0x45d   : > { %v3244_v55 = vpop.permute.xlu1 %3243  ;;  %3756 = vmatprep.subr.bf16.mxu0 %v5190_v5  ;;  %v3034_v50 = vpop.permute.xlu0 %3033  ;;  %v3771_v26 = vpack.c.bf16 %v3266_v23, %v3264_v44  ;;  %v3920_v5 = vld [vmem:[%s5170_s1 + $0x18] ss:$0 sm:$0xff] }
 0x45e   : > { %v3038_v19 = vsel %vm859_vm6, %v4897_v54, %v3034_v50  ;;  %v3042_v37 = vsel %vm859_vm6, %v3034_v50, %v4897_v54  ;;  %v3156_v54 = vmul.f32 %v3150_v53, %v4184_v4 }
 0x45f   : > { %v3049_v30 = vmul.f32 %v3038_v19, %v4178_v2  ;;  %v3050_v17 = vmul.f32 %v3042_v37, %v4158_v56  ;;  %3666 = vmatmul.mubr.msk.f32.vlgmr.msra.gmra.mrb[4].mxu0 %vm2572_vm11, %v3665_v63 }
 0x460   : > { %3758 = vmatpush1.bf16.msra.mxu0 %v5191_v16  ;;  %3120 = vmatprep.mubr.f32.mxu0 %v5186_v33  ;;  %v3763_v6 = vpack.c.bf16 %v3156_v54, %v3154_v27 }
 0x461   : > { %v3761_v2 = vpack.c.bf16 %v3049_v30, %v3047_v57  ;;  %v3252_v39 = vpop.permute.xlu1 %3251  ;;  %v3352_v56 = vpop.permute.xlu0 %3351  ;;  %v3759_v51 = vpack.c.bf16 %v3050_v17, %v3048_v18 }
 0x463   : > { %3760 = vmatprep.subr.bf16.mxu0 %v3759_v51 }
 0x464   : > { %3762 = vmatpush1.bf16.msra.mxu0 %v3761_v2  ;;  %v3671_v2 = vld [vmem:[%s5175_s6 + $0x1c] sm:$0x7] }
 0x465   : > { %v3350_v47 = vpop.permute.xlu1 %3349  ;;  %3764 = vmatprep.subr.bf16.mxu0 %v3763_v6  ;;  %v3144_v38 = vpop.permute.xlu0 %3143 }
 0x466   : > { %v3148_v46 = vsel %vm972_vm7, %v4983_v58, %v3144_v38  ;;  %v3152_v24 = vsel %vm972_vm7, %v3144_v38, %v4983_v58  ;;  %v5193_v58 = vld [vmem:[#allocation3_spill] sm:$0xff] }
 0x467   : > { %v3159_v11 = vmul.f32 %v3148_v46, %v4204_v20  ;;  %v3160_v7 = vmul.f32 %v3152_v24, %v4184_v4  ;;  %3668 = vmatmul.mubr.msk.f32.vlgmr.msra.gmra.mrb[4].mxu0 %vm2572_vm11, %v3667_v0  ;;  %v3263_v1 = vmul.f32 %v3255_v45, %v5193_v58  ;;  %v3257_v4 = vsel %vm1085_vm8, %v3244_v55, %v3252_v39 }
 0x468   : > { %3766 = vmatpush1.bf16.msra.mxu0 %v3765_v10  ;;  %3230 = vmatprep.mubr.f32.mxu0 %v5186_v33  ;;  %v3261_v20 = vsel %vm1085_vm8, %v3252_v39, %v3244_v55  ;;  %v3265_v41 = vmul.f32 %v3256_v9, %v5193_v58  ;;  %v3267_v49 = vmul.f32 %v3257_v4, %v5193_v58 }
 0x469   : > { %v3769_v31 = vpack.c.bf16 %v3159_v11, %v3157_v43  ;;  %v3358_v61 = vpop.permute.xlu1 %3357  ;;  %v3360_v60 = vpop.permute.xlu0 %3359  ;;  %v3767_v22 = vpack.c.bf16 %v3160_v7, %v3158_v32  ;;  %v3268_v40 = vmul.f32 %v3261_v20, %v5192_v28  ;;  %v3673_v43 = vld [vmem:[%s5175_s6 + $0x20] sm:$0x7] }
 0x46a   : > { %v3369_v48 = vsel %vm1198_vm9, %v3358_v61, %v3350_v47  ;;  %v3370_v3 = vsel %vm1198_vm9, %v3360_v60, %v3352_v56  ;;  %v3773_v62 = vpack.c.bf16 %v3265_v41, %v3263_v1  ;;  %v3365_v42 = vsel %vm1198_vm9, %v3350_v47, %v3358_v61 }
 0x46b   : > { %3768 = vmatprep.subr.bf16.mxu0 %v3767_v22  ;;  %v3366_v63 = vsel %vm1198_vm9, %v3352_v56, %v3360_v60  ;;  %v3374_v50 = vmul.f32 %v3920_v5, %v3369_v48  ;;  %v3376_v57 = vmul.f32 %v3920_v5, %v3370_v3 }
 0x46c   : > { %3770 = vmatpush1.bf16.msra.mxu0 %v3769_v31 }
 0x46d   : > { %v3354_v35 = vpop.permute.xlu1 %3353  ;;  %3772 = vmatprep.subr.bf16.mxu0 %v3771_v26  ;;  %v3254_v34 = vpop.permute.xlu0 %3253  ;;  %v3779_v16 = vpack.c.bf16 %v3376_v57, %v3374_v50 }
 0x46e   : > { %v3258_v53 = vsel %vm1085_vm8, %v5027_v52, %v3254_v34  ;;  %v3262_v55 = vsel %vm1085_vm8, %v3254_v34, %v5027_v52  ;;  %v3921_v52 = vld [vmem:[%s5170_s1 + $0x10] ss:$0 sm:$0xff] }
 0x46f   : > { %v3269_v15 = vmul.f32 %v3258_v53, %v5193_v58  ;;  %v3270_v19 = vmul.f32 %v3262_v55, %v5192_v28  ;;  %3670 = vmatmul.mubr.msk.f32.vlgmr.msra.gmra.mrb[4].mxu0 %vm2572_vm11, %v3669_v59  ;;  %v3373_v17 = vmul.f32 %v3921_v52, %v3365_v42  ;;  %v3375_v25 = vmul.f32 %v3921_v52, %v3366_v63 }
 0x470   : > { %3774 = vmatpush1.bf16.msra.mxu0 %v3773_v62  ;;  %3340 = vmatprep.mubr.f32.mxu0 %v5186_v33 }
 0x471   : > { %v3777_v37 = vpack.c.bf16 %v3269_v15, %v3267_v49  ;;  %v3362_v18 = vpop.permute.xlu1 %3361  ;;  %v3356_v27 = vpop.permute.xlu0 %3355  ;;  %v3775_v30 = vpack.c.bf16 %v3270_v19, %v3268_v40  ;;  %v3781_v56 = vpack.c.bf16 %v3375_v25, %v3373_v17 }
 0x472   : > { %v3367_v54 = vsel %vm1198_vm9, %v3354_v35, %v3362_v18  ;;  %v3371_v14 = vsel %vm1198_vm9, %v3362_v18, %v3354_v35 }
 0x473   : > { %3776 = vmatprep.subr.bf16.mxu0 %v3775_v30  ;;  %v3377_v21 = vmul.f32 %v3921_v52, %v3367_v54  ;;  %v3378_v6 = vmul.f32 %v3920_v5, %v3371_v14 }
 0x474   : > { %3778 = vmatpush1.bf16.msra.mxu0 %v3777_v37 }
 0x475   : > { %3780 = vmatprep.subr.bf16.mxu0 %v3779_v16  ;;  %v3364_v39 = vpop.permute.xlu0 %3363 }
 0x476   : > { %v3368_v51 = vsel %vm1198_vm9, %v3356_v27, %v3364_v39  ;;  %v3372_v36 = vsel %vm1198_vm9, %v3364_v39, %v3356_v27 }
 0x477   : > { %v3379_v12 = vmul.f32 %v3921_v52, %v3368_v51  ;;  %v3380_v13 = vmul.f32 %v3920_v5, %v3372_v36  ;;  %3672 = vmatmul.mubr.msk.f32.vlgmr.msra.gmra.mrb[4].mxu0 %vm2572_vm11, %v3671_v2 }
 0x478   : > { %3782 = vmatpush1.bf16.msra.mxu0 %v3781_v56  ;;  %3450 = vmatprep.mubr.f32.mxu0 %v5186_v33 }
 0x479   : > { %v3785_v0 = vpack.c.bf16 %v3379_v12, %v3377_v21  ;;  %v3783_v10 = vpack.c.bf16 %v3380_v13, %v3378_v6 }
 0x47b   : > { %3784 = vmatprep.subr.bf16.mxu0 %v3783_v10 }
 0x47c   : > { %3786 = vmatpush1.bf16.msra.mxu0 %v3785_v0 }
 0x47f   : > { %3674 = vmatmul.mubr.msk.f32.vlgmr.msra.gmra.mrb[4].mxu0 %vm2572_vm11, %v3673_v43 }
 0x482   : > { %v3463_v8 = vpop.permute.xlu1 %3462 }
 0x552   : > { %v3452_v47 = vpop.f32.mrb[4].mxu0 }
 0x553   : > { %v3465_v38 = vadd.f32 %v3463_v8, %v3452_v47  ;;  %v3454_v29 = vpop.f32.mrb[5].mxu0 }
 0x554   : > { %v3466_v45 = vadd.f32 %v3463_v8, %v3454_v29 }
 0x556   : > { %v3469_v33 = vcombine.low %v3465_v38, %v3466_v45 }
 0x558   : > { %3471 = vst [vmem:[%s305_s18] sm:$0x77] %v3469_v33 }
 0x559 PF: > { %s18_s27 = sadd.s32 1, %s3928_s27  }
 0x55a   : > { %p15_p4 = scmp.ge.s32.totalorder %s18_s27, 4  }
 0x55c   :  { %17 = sbr.rel (!%p15_p4) target bundleno = 1 (0x1), region = 106 }

</bundles_post_ra>
